<compile_context>
chip_gen: v7x
topology: tpu7x:2x2x1
jax: 0.10.0
libtpu: 0.0.40
codegen_flags: <defaults>
</compile_context>

<pallas_src>
import functools

import jax
import jax.numpy as jnp
from jax.experimental import pallas as pl
from jax.experimental.pallas import tpu as pltpu


# ----------------------------------------------------------------------------
# Path A: small/medium codebooks. Single-shot (TN, K) score, argmin, in-kernel
# one-hot gather on the MXU. q written back in x.dtype.
# ----------------------------------------------------------------------------
def _vq_gather_kernel(x_ref, e_ref, esq_ref, q_ref, idx_ref, sse_ref):
    xf = x_ref[...].astype(jnp.float32)          # (TN, D) f32 view for SSE
    xm = x_ref[...].astype(e_ref.dtype)          # matmul operand (bf16 or f32)
    e = e_ref[...]                               # (K, D) codebook (compute dtype)
    e_sq = esq_ref[...]                          # (1, K) f32 ||e_k||^2 (hoisted)

    # argmin_k ||x - e_k||^2 == argmin_k (||e_k||^2 - 2 x.e_k); ||x||^2 dropped
    # (per-row constant, argmin-invariant).
    xe = jnp.dot(xm, e.T, preferred_element_type=jnp.float32)   # (TN, K) MXU
    score = e_sq - 2.0 * xe
    idx = jnp.argmin(score, axis=1).astype(jnp.int32)           # (TN,)

    tn, k = score.shape
    onehot = (jax.lax.broadcasted_iota(jnp.int32, (tn, k), 1)
              == idx[:, None]).astype(e.dtype)                  # exact in bf16
    q = jnp.dot(onehot, e, preferred_element_type=jnp.float32)  # (TN, D)

    q_ref[...] = q.astype(q_ref.dtype)                          # x.dtype writeback
    idx_ref[...] = idx.reshape(idx_ref.shape)                   # lane-dense store

    diff = q - xf
    sse_ref[...] = jnp.sum(diff * diff, axis=0).reshape(sse_ref.shape)


# ----------------------------------------------------------------------------
# Path B: large codebooks. K-blocked running min/argmin; no full (TN, K) temps
# and no one-hot gather matmul. Only idx + per-row SSE leave the kernel; the
# codebook gather happens in the wrapper (jnp.take).
# ----------------------------------------------------------------------------
def _vq_blocked_kernel(x_ref, e_ref, esq_ref, idx_ref, sse_ref, *, k_block):
    xf = x_ref[...].astype(jnp.float32)
    xm = x_ref[...].astype(e_ref.dtype)
    tn = xm.shape[0]
    k = e_ref.shape[0]
    num_kb = k // k_block

    best = jnp.full((tn, 1), jnp.inf, dtype=jnp.float32)
    bidx = jnp.zeros((tn, 1), dtype=jnp.int32)
    for j in range(num_kb):                      # static unroll (num_kb is Python int)
        eb = e_ref[pl.ds(j * k_block, k_block), :]                # (KB, D)
        xe = jnp.dot(xm, eb.T, preferred_element_type=jnp.float32)
        sc = esq_ref[:, pl.ds(j * k_block, k_block)] - 2.0 * xe   # (TN, KB)
        loc_min = jnp.min(sc, axis=1, keepdims=True)
        loc_idx = (jnp.argmin(sc, axis=1).astype(jnp.int32) + j * k_block)[:, None]
        take = loc_min < best                    # strict '<' keeps first block on ties
        bidx = jnp.where(take, loc_idx, bidx)
        best = jnp.minimum(best, loc_min)

    idx_ref[...] = bidx[:, 0].reshape(idx_ref.shape)
    # ||x - e_idx||^2 == ||x||^2 + min_k score; clamp mild cancellation.
    xsq = jnp.sum(xf * xf, axis=1, keepdims=True)                 # XLU lane-reduce
    sse = jnp.maximum(xsq + best, 0.0)
    sse_ref[...] = sse[:, 0].reshape(sse_ref.shape)


def _pick_tile_n(n, requested):
    cap = min(requested, n)
    if n >= 256:
        cap = min(cap, n // 2)     # v7x: >= 2 grid steps so both TensorCores get work
    t = max(128, (cap // 128) * 128)
    while t > 128 and n % t != 0:  # largest multiple of 128 that divides n
        t -= 128
    return t


def vector_quantizer(x, embedding, commitment_cost, *, tile_n=1024,
                     distance_dtype=None, gather_in_kernel=None, k_block=512):
    """x: (..., D) with trailing dim == embedding_dim; embedding: (K, D)."""
    k, d = embedding.shape
    orig_shape = x.shape
    flat_x = x.reshape(-1, d)                    # keep input dtype (bf16-friendly)
    n = flat_x.shape[0]

    # TODO(synk): add a pad/mask path for N not a multiple of 128.
    assert n % 128 == 0, "flattened token count must be a multiple of 128"
    tile_n = _pick_tile_n(n, tile_n)
    num_tiles = n // tile_n

    # bf16 MXU inputs when activations are bf16 (f32 accumulation); f32 inputs
    # keep an f32 matmul so argmin matches the f32 reference exactly.
    if distance_dtype is None:
        distance_dtype = jnp.bfloat16 if x.dtype == jnp.bfloat16 else jnp.float32
    e_c = embedding.astype(distance_dtype)
    e32 = e_c.astype(jnp.float32)
    e_sq = jnp.sum(e32 * e32, axis=1)[None, :]   # (1, K) f32, hoisted out of the grid

    cb_bytes = k * d * jnp.dtype(distance_dtype).itemsize
    if gather_in_kernel is None:
        gather_in_kernel = k <= 1024             # one-hot gather only for small K
    kb = k if gather_in_kernel else max(128, (min(k_block, k) // 128) * 128)
    if not gather_in_kernel:
        assert k % kb == 0, "num_embeddings must be a multiple of k_block"

    # Constant blocks: single-buffer once the codebook is big enough to matter
    # (default double-buffering would hold it twice -> painful on v7x's 64 MiB).
    const_kwargs = ({"pipeline_mode": pl.Buffered(1)}
                    if cb_bytes >= (2 << 20) else {})

    x_spec = pl.BlockSpec((tile_n, d), lambda i: (i, 0))
    e_spec = pl.BlockSpec((k, d), lambda i: (0, 0), **const_kwargs)
    esq_spec = pl.BlockSpec((1, k), lambda i: (0, 0), **const_kwargs)
    idx_spec = pl.BlockSpec((1, tile_n // 128, 128), lambda i: (i, 0, 0))
    idx_shape = jax.ShapeDtypeStruct((num_tiles, tile_n // 128, 128), jnp.int32)

    # Rough per-call VMEM budget (double-buffered tiles + constants + temps),
    # raised above the default scoped limit (16 MiB v5e / 32 MiB v6e,v7x).
    est = (4 * tile_n * d * x.dtype.itemsize        # x + q tiles, double-buffered
           + 2 * (cb_bytes + k * 4)                 # codebook + ||e||^2
           + 4 * tile_n * 4 + 2 * d * 4             # idx / sse output buffers
           + 3 * tile_n * kb * 4)                   # score / one-hot temps
    vmem_limit = int(min(64 << 20, max(32 << 20, 2 * est)))
    cparams = pltpu.CompilerParams(
        dimension_semantics=("parallel",),          # no cross-iteration deps
        vmem_limit_bytes=vmem_limit)

    if gather_in_kernel:
        q_flat, idx_tiles, sse_tiles = pl.pallas_call(
            _vq_gather_kernel,
            out_shape=(
                jax.ShapeDtypeStruct((n, d), x.dtype),               # q in x.dtype
                idx_shape,
                jax.ShapeDtypeStruct((num_tiles, 1, d), jnp.float32),  # SSE partials
            ),
            grid_spec=pltpu.PrefetchScalarGridSpec(
                num_scalar_prefetch=0, grid=(num_tiles,),
                in_specs=[x_spec, e_spec, esq_spec],
                out_specs=[x_spec, idx_spec,
                           pl.BlockSpec((1, 1, d), lambda i: (i, 0, 0))]),
            compiler_params=cparams,
        )(flat_x, e_c, e_sq)
        quantized = q_flat.reshape(orig_shape)
        idx_flat = idx_tiles.reshape(n)
    else:
        idx_tiles, sse_tiles = pl.pallas_call(
            functools.partial(_vq_blocked_kernel, k_block=kb),
            out_shape=(
                idx_shape,
                jax.ShapeDtypeStruct((num_tiles, tile_n // 128, 128), jnp.float32),
            ),
            grid_spec=pltpu.PrefetchScalarGridSpec(
                num_scalar_prefetch=0, grid=(num_tiles,),
                in_specs=[x_spec, e_spec, esq_spec],
                out_specs=[idx_spec,
                           pl.BlockSpec((1, tile_n // 128, 128),
                                        lambda i: (i, 0, 0))]),
            compiler_params=cparams,
        )(flat_x, e_c, e_sq)
        idx_flat = idx_tiles.reshape(n)
        quantized = jnp.take(embedding, idx_flat, axis=0).astype(x.dtype)
        quantized = quantized.reshape(orig_shape)

    mse = jnp.sum(sse_tiles.astype(jnp.float32)) / (n * d)
    # Forward value: e_latent_loss == q_latent_loss numerically.
    # TODO(synk): straight-through estimator (x + (q - x).detach()) and the
    # detach asymmetry in the loss are autograd-only (needs a custom_vjp for
    # training); forward values match the PyTorch module.
    loss = (1.0 + commitment_cost) * mse
    indices = idx_flat.reshape(n, 1)
    return quantized, loss, indices


if __name__ == "__main__":
    key = jax.random.PRNGKey(0)
    kx, ke = jax.random.split(key)

    num_embeddings = 256
    embedding_dim = 128          # D >= 128 keeps all tiles / stores lane-dense
    commitment_cost = 0.25
    B, H, W = 2, 16, 8           # N = 256 flat vectors -> 2 grid steps of 128

    x = jax.random.normal(kx, (B, H, W, embedding_dim), dtype=jnp.float32)
    embedding = jax.random.uniform(
        ke, (num_embeddings, embedding_dim),
        minval=-1.0 / num_embeddings, maxval=1.0 / num_embeddings,
        dtype=jnp.float32)

    def check(x_in, q, loss, idx, *, gap_tol, q_tol, loss_tol):
        flat = x_in.reshape(-1, embedding_dim).astype(jnp.float32)
        emb = embedding.astype(jnp.float32)
        dist = (jnp.sum(flat ** 2, 1, keepdims=True)
                - 2.0 * flat @ emb.T + jnp.sum(emb ** 2, 1))      # (N, K)
        ii = idx[:, 0]
        # 1) chosen code is (within tolerance) the nearest codebook entry
        chosen = jnp.take_along_axis(dist, ii[:, None], axis=1)[:, 0]
        gap = float(jnp.max(chosen - jnp.min(dist, axis=1)))
        assert gap <= gap_tol, f"non-optimal code selected (gap={gap})"
        # 2) quantized rows are the selected codebook rows (in q's dtype)
        qsel = jnp.take(emb, ii, axis=0).astype(q.dtype).astype(jnp.float32)
        qk = q.reshape(-1, embedding_dim).astype(jnp.float32)
        assert jnp.allclose(qk, qsel, atol=q_tol), "quantized rows mismatch"
        # 3) loss matches the reference for the kernel's own assignment
        ref_loss = (1.0 + commitment_cost) * jnp.mean((qsel - flat) ** 2)
        assert abs(float(loss) - float(ref_loss)) <= loss_tol, (
            float(loss), float(ref_loss))

    # 1) f32, in-kernel one-hot gather path (strict checks).
    q1, l1, i1 = vector_quantizer(x, embedding, commitment_cost)
    jax.block_until_ready((q1, l1, i1))
    check(x, q1, l1, i1, gap_tol=1e-3, q_tol=1e-5, loss_tol=1e-3)

    # 2) f32, K-blocked running-argmin path with wrapper-side gather (forced).
    q2, l2, i2 = vector_quantizer(x, embedding, commitment_cost,
                                  gather_in_kernel=False, k_block=128)
    jax.block_until_ready((q2, l2, i2))
    check(x, q2, l2, i2, gap_tol=1e-3, q_tol=1e-5, loss_tol=1e-3)

    # 3) bf16 activations: bf16 MXU distance matmul + bf16 q writeback.
    xb = x.astype(jnp.bfloat16)
    q3, l3, i3 = vector_quantizer(xb, embedding, commitment_cost)
    jax.block_until_ready((q3, l3, i3))
    assert q3.dtype == jnp.bfloat16
    check(xb, q3, l3, i3, gap_tol=5e-2, q_tol=1e-5, loss_tol=2e-2)

    print("KERNEL_OK")
</pallas_src>

<mosaic_0001>
module attributes {stable_mosaic.version = 11 : i64} {
  func.func @_vq_gather_kernel(%arg0: i32, %arg1: memref<128x128xf32, #tpu.memory_space<vmem>>, %arg2: memref<256x128xf32, #tpu.memory_space<vmem>>, %arg3: memref<1x256xf32, #tpu.memory_space<vmem>>, %arg4: memref<128x128xf32, #tpu.memory_space<vmem>>, %arg5: memref<1x1x128xi32, #tpu.memory_space<vmem>>, %arg6: memref<1x1x128xf32, #tpu.memory_space<vmem>>) attributes {dimension_semantics = [#tpu.dimension_semantics<parallel>], iteration_bounds = array<i64: 2>, scalar_prefetch = 0 : i64, scratch_operands = 0 : i64, tpu.core_type = #tpu.core_type<tc>, window_params = [{transform_indices = @transform_0, window_bounds = array<i64: 128, 128>}, {pipeline_mode = #tpu.pipeline_mode<synchronous>, transform_indices = @transform_1, window_bounds = array<i64: 256, 128>}, {pipeline_mode = #tpu.pipeline_mode<synchronous>, transform_indices = @transform_2, window_bounds = array<i64: 1, 256>}, {transform_indices = @transform_3, window_bounds = array<i64: 128, 128>}, {transform_indices = @transform_4, window_bounds = array<i64: 1, 1, 128>}, {transform_indices = @transform_5, window_bounds = array<i64: 1, 1, 128>}]} {
    %c0 = arith.constant 0 : index
    %c0_0 = arith.constant 0 : index
    %0 = vector.load %arg1[%c0, %c0_0] : memref<128x128xf32, #tpu.memory_space<vmem>>, vector<128x128xf32>
    %c0_1 = arith.constant 0 : index
    %c0_2 = arith.constant 0 : index
    %1 = vector.load %arg1[%c0_1, %c0_2] : memref<128x128xf32, #tpu.memory_space<vmem>>, vector<128x128xf32>
    %c0_3 = arith.constant 0 : index
    %c0_4 = arith.constant 0 : index
    %2 = vector.load %arg2[%c0_3, %c0_4] : memref<256x128xf32, #tpu.memory_space<vmem>>, vector<256x128xf32>
    %c0_5 = arith.constant 0 : index
    %c0_6 = arith.constant 0 : index
    %3 = vector.load %arg3[%c0_5, %c0_6] : memref<1x256xf32, #tpu.memory_space<vmem>>, vector<1x256xf32>
    %4 = tpu.transpose %2, [1, 0] : vector<256x128xf32> -> vector<128x256xf32>
    %cst = arith.constant dense<0.000000e+00> : vector<128x256xf32>
    %5 = tpu.matmul %1, %4, %cst {dimension_numbers = #tpu.dot_dimension_numbers<[1], [0], [0], [1], [0, 0, 1, 1], [], []>} : vector<128x128xf32>, vector<128x256xf32>, vector<128x256xf32> -> vector<128x256xf32>
    %cst_7 = arith.constant 2.000000e+00 : f32
    %6 = vector.broadcast %cst_7 : f32 to vector<128x256xf32>
    %7 = arith.mulf %6, %5 : vector<128x256xf32>
    %8 = vector.broadcast %3 : vector<1x256xf32> to vector<128x256xf32>
    %9 = arith.subf %8, %7 : vector<128x256xf32>
    %10 = tpu.reduce_index %9 {axis = 1 : i32, kind = #tpu.reduction_kind<arg_min>} : vector<128x256xf32> -> vector<128xi32>
    %11 = tpu.iota {dimensions = array<i32: 1>} : vector<128x256xi32>
    %12 = vector.shape_cast %10 : vector<128xi32> to vector<128x1xi32>
    %13 = vector.broadcast %12 : vector<128x1xi32> to vector<128x256xi32>
    %14 = arith.cmpi eq, %11, %13 : vector<128x256xi32>
    %15 = arith.extui %14 : vector<128x256xi1> to vector<128x256xi32>
    %16 = arith.sitofp %15 : vector<128x256xi32> to vector<128x256xf32>
    %cst_8 = arith.constant dense<0.000000e+00> : vector<128x128xf32>
    %17 = tpu.matmul %16, %2, %cst_8 {dimension_numbers = #tpu.dot_dimension_numbers<[1], [0], [0], [1], [0, 0, 1, 1], [], []>} : vector<128x256xf32>, vector<256x128xf32>, vector<128x128xf32> -> vector<128x128xf32>
    %c0_9 = arith.constant 0 : index
    %c0_10 = arith.constant 0 : index
    %18 = vector.load %arg4[%c0_9, %c0_10] : memref<128x128xf32, #tpu.memory_space<vmem>>, vector<128x128xf32>
    tpu.vector_store %arg4[%c0_9, %c0_10], %17 {strides = array<i32>} : memref<128x128xf32, #tpu.memory_space<vmem>>, vector<128x128xf32>,
    %19 = vector.shape_cast %10 : vector<128xi32> to vector<1x1x128xi32>
    %c0_11 = arith.constant 0 : index
    %c0_12 = arith.constant 0 : index
    %c0_13 = arith.constant 0 : index
    %20 = vector.load %arg5[%c0_11, %c0_12, %c0_13] : memref<1x1x128xi32, #tpu.memory_space<vmem>>, vector<1x1x128xi32>
    tpu.vector_store %arg5[%c0_11, %c0_12, %c0_13], %19 {strides = array<i32>} : memref<1x1x128xi32, #tpu.memory_space<vmem>>, vector<1x1x128xi32>,
    %21 = arith.subf %17, %0 : vector<128x128xf32>
    %22 = arith.mulf %21, %21 : vector<128x128xf32>
    %cst_14 = arith.constant dense<0.000000e+00> : vector<128xf32>
    %23 = vector.multi_reduction <add>, %22, %cst_14 [0] : vector<128x128xf32> to vector<128xf32>
    %24 = vector.shape_cast %23 : vector<128xf32> to vector<1x1x128xf32>
    %c0_15 = arith.constant 0 : index
    %c0_16 = arith.constant 0 : index
    %c0_17 = arith.constant 0 : index
    %25 = vector.load %arg6[%c0_15, %c0_16, %c0_17] : memref<1x1x128xf32, #tpu.memory_space<vmem>>, vector<1x1x128xf32>
    tpu.vector_store %arg6[%c0_15, %c0_16, %c0_17], %24 {strides = array<i32>} : memref<1x1x128xf32, #tpu.memory_space<vmem>>, vector<1x1x128xf32>,
    return
  }
  func.func @transform_0(%arg0: i32) -> (i32, i32) {
    %c0_i32 = arith.constant 0 : i32
    %c0_i32_0 = arith.constant 0 : i32
    return %arg0, %c0_i32 : i32, i32
  }
  func.func @transform_1(%arg0: i32) -> (i32, i32) {
    %c0_i32 = arith.constant 0 : i32
    %c0_i32_0 = arith.constant 0 : i32
    %c0_i32_1 = arith.constant 0 : i32
    return %c0_i32, %c0_i32_0 : i32, i32
  }
  func.func @transform_2(%arg0: i32) -> (i32, i32) {
    %c0_i32 = arith.constant 0 : i32
    %c0_i32_0 = arith.constant 0 : i32
    %c0_i32_1 = arith.constant 0 : i32
    return %c0_i32, %c0_i32_0 : i32, i32
  }
  func.func @transform_3(%arg0: i32) -> (i32, i32) {
    %c0_i32 = arith.constant 0 : i32
    %c0_i32_0 = arith.constant 0 : i32
    return %arg0, %c0_i32 : i32, i32
  }
  func.func @transform_4(%arg0: i32) -> (i32, i32, i32) {
    %c0_i32 = arith.constant 0 : i32
    %c0_i32_0 = arith.constant 0 : i32
    %c0_i32_1 = arith.constant 0 : i32
    return %arg0, %c0_i32, %c0_i32_0 : i32, i32, i32
  }
  func.func @transform_5(%arg0: i32) -> (i32, i32, i32) {
    %c0_i32 = arith.constant 0 : i32
    %c0_i32_0 = arith.constant 0 : i32
    %c0_i32_1 = arith.constant 0 : i32
    return %arg0, %c0_i32, %c0_i32_0 : i32, i32, i32
  }
}

</mosaic_0001>

<bundles_post_ra>
// kernel: tpu_custom_call.1
= control target key start
LH: loop header
LB: loop body
LE: loop exit
PB: predicated region body
PF: predicated region fallthrough
CT: control target
= control target key end

     0   :  { %11 = vsyncpa [#allocation3], 0  ;;  %s2708_s0 = inlined_call_operand.hbm [shape: f32[256,128], index: 0, kind: input, shape index: {}]   ;;  %s2709_s1 = inlined_call_operand.hbm [shape: f32[256,128], index: 1, kind: input, shape index: {}]   ;;  %s2710_s2 = inlined_call_operand.vmem [shape: f32[1,256], index: 2, kind: input, shape index: {}]   ;;  %s2711_s3 = inlined_call_operand.hbm [shape: f32[256,128], index: 3, kind: output, shape index: {0}]   ;;  %s2712_s4 = inlined_call_operand.hbm [shape: s32[2,1,128], index: 4, kind: output, shape index: {1}]   ;;  %s2713_s5 = inlined_call_operand.hbm [shape: f32[2,1,128], index: 5, kind: output, shape index: {2}]  }
   0x1   :  { %13 = vsyncpa [#allocation3 + $0x1], 0 }
   0x2   :  { %14 = vsyncpa [#allocation6], 0 }
   0x3   :  { %15 = vsyncpa [#allocation4], 0 }
   0x4   :  { %17 = vsyncpa [#allocation4 + $0x1], 0 }
   0x5   :  { %18 = vsyncpa [#allocation9], 0 }
   0x6   :  { %20 = vsyncpa [#allocation9 + $0x1], 0  ;;  %s1908_s18 = smov 0   ;;  %s1910_s19 = smov 0  }
   0x7   :  { %s1912_s20 = smov 0   ;;  %s1914_s21 = smov 0  }
   0x8 LB: > { %s1929_s22 = sadd.s32 4294967295, %s1866_s21   ;;  %s1297_s23 = sadd.s32 4294967294, %s1866_s21   ;;  %s1866_s21 = sphi %s1914_s21, %s2733_s21   ;;  %s1862_s20 = sphi %s1912_s20, %s2732_s20   ;;  %s1858_s19 = sphi %s1910_s19, %s2731_s19   ;;  %s1854_s18 = sphi %s1908_s18, %s2730_s18  }
   0x9   : > { %p46_p0 = scmp.ne.s32.totalorder %s1858_s19, %s1854_s18  ;;  %p2714_p1 = scmp.eq.s32.totalorder %s1929_s22, 0 }
   0xa   : > { %p118_p3 = scmp.eq.s32.totalorder %s1297_s23, 1  ;;  %p1298_p5 = scmp.ge.s32.totalorder %s1866_s21, 1 }
   0xb   : > { %p1940_p4 = por %p2714_p1, %p46_p0  ;;  %p177_p7 = scmp.lt.s32.totalorder %s1866_s21, 3 }
   0xc   : > { %p1945_p6 = por %p118_p3, %p46_p0  ;;  %s1868_s27 = smov [#allocation5]  }
   0xd   : > { %s2717_s24 = scalar_select %p1940_p4, 1, 0 }
   0xe   : > { %s2718_s25 = scalar_select %p1945_p6, 1, 0 }
   0xf   : > { %p1950_p8 = pnand %p1298_p5, %p177_p7  ;;  %s189_s28 = sshll.u32 %s1868_s27, 4  ;;  %s1954_s28 = int_to_ptr.vmem [resolvable:$true] %s189_s28 }
  0x10   : > { %s1966_s30 = sadd.s32 1, %s1866_s21   ;;  %s33_s6 = sadd.s32 1, %s1862_s20 }
  0x11   : > { %s2719_s26 = scalar_select %p1950_p8, 1, 0 }
  0x12   : > { %p1601_p9 = pneg %p1950_p8  ;;  %s30_s7 = ssub.s32 %s1866_s21, %s1966_s30 }
  0x13   : > { %s1678_s10 = scalar_lea.hbm %s2709_s1, 4096 }
  0x14   : > { %p1961_p11 = pnand %p1601_p9, %p2714_p1  ;;  %p1679_p12 = scmp.ne.s32.totalorder %s2709_s1, %s1678_s10 }
  0x15   : > { %p1685_p5 = scmp.lt.u32.totalorder %s1678_s10, %s2709_s1 }
  0x16   : > { %p1680_p13 = pneg %p1961_p11 }
  0x18   : > { %p1681_p0 = pnand %p1680_p13, %p1679_p12 }
  0x1a   : > { %p1682_p3 = pneg %p1681_p0 }
  0x1c   : > { %p1687_p7 = pnand %p1685_p5, %p1682_p3 }
  0x1e   : > { %1690 = shalt.err (!%p1687_p7)
}
  0x1f   : > { %s1691_s15 = scalar_lea.vmem %s1954_s28, 4096  ;;  %p1699_p2 = scmp.lt.s32.totalorder %s1954_s28, %s1954_s28 }
  0x20   : > { %p1692_p9 = scmp.ne.s32.totalorder %s1954_s28, %s1691_s15  ;;  %p1700_p6 = scmp.lt.s32.totalorder %s1691_s15, %s1691_s15 }
  0x22   : > { %p1694_p10 = pnand %p1692_p9, %p1680_p13  ;;  %p1701_p4 = por %p1700_p6, %p1699_p2 }
  0x24   : > { %p1695_p1 = pneg %p1694_p10 }
  0x26   : > { %p1702_p8 = pnand %p1701_p4, %p1695_p1 }
  0x28   : > { %1705 = shalt.err (!%p1702_p8)
}
  0x29   : > { %s1869_s16 = smov 128   ;;  %s1870_s17 = smov 8  }
  0x2a   : > { %1604 = dma.hbm_to_vmem [thread:$0]  (!%p1961_p11), %s2709_s1, 4096, %s1954_s28, [#allocation6], %s1869_s16, %s1869_s16, %s1870_s17  }
  0x2b   : > { %p31_p1 = scmp.eq.s32.totalorder %s30_s7, 0  ;;  %p40_p2 = scmp.ne.s32.totalorder %s1862_s20, %s1858_s19 }
  0x2c   : > { %p41_p4 = scmp.eq.s32.totalorder %s1866_s21, 0  ;;  %p1620_p6 = scmp.lt.s32.totalorder %s1866_s21, 2 }
  0x2d   : > { %s2000_s9 = scalar_select %p31_p1, %s1862_s20, %s33_s6  }
  0x2e   : > { %p42_p8 = por %p41_p4, %p40_p2  ;;  %p2721_p10 = scmp.eq.s32.totalorder %s1929_s22, 1 }
  0x2f   : > { %s206_s29 = sand.u32 1, %s1862_s20   ;;  %s1379_s11 = sshll.u32 %s1866_s21, 11 }
  0x30   : > { %p2004_p12 = por %p2721_p10, %p40_p2  ;;  %s1301_s12 = sshll.u32 %s206_s29, 7 }
  0x31   : > { %s2013_s15 = scalar_lea.hbm %s2708_s0, %s1379_s11  ;;  %s210_s28 = scalar_lea.vmem [#allocation2], %s1301_s12 }
  0x32   : > { %s217_s6 = sshll.u32 %s210_s28, 4  ;;  %p2015_p11 = pnand %p1620_p6, %p42_p8  ;;  %s2019_s6 = int_to_ptr.vmem [resolvable:$true] %s217_s6 }
  0x33   : > { %s2021_s27 = scalar_lea.sflag [#allocation3], %s206_s29  ;;  %s1706_s8 = scalar_lea.hbm %s2013_s15, 2048 }
  0x34   : > { %p1707_p13 = scmp.ne.s32.totalorder %s2013_s15, %s1706_s8  ;;  %p1708_p0 = pneg %p2015_p11 }
  0x35   : > { %s1711_s13 = scalar_lea.hbm %s2708_s0, 4096  ;;  %p1712_p7 = scmp.lt.u32.totalorder %s2013_s15, %s2708_s0 }
  0x36   : > { %p1709_p3 = pnand %p1708_p0, %p1707_p13  ;;  %p1713_p9 = scmp.lt.u32.totalorder %s1711_s13, %s1706_s8 }
  0x37   : > { %p1715_p2 = scmp.lt.u32.totalorder %s1706_s8, %s2013_s15 }
  0x38   : > { %p1710_p5 = pneg %p1709_p3  ;;  %p1714_p1 = por %p1713_p9, %p1712_p7 }
  0x3a   : > { %p1716_p4 = por %p1715_p2, %p1714_p1 }
  0x3c   : > { %p1717_p6 = pnand %p1716_p4, %p1710_p5 }
  0x3e   : > { %1720 = shalt.err (!%p1717_p6)
}
  0x3f   : > { %s1721_s29 = scalar_lea.vmem %s2019_s6, 2048  ;;  %s1871_s11 = smov [#allocation2]  }
  0x40   : > { %p1722_p8 = scmp.ne.s32.totalorder %s2019_s6, %s1721_s29  ;;  %s1726_s12 = sshll.u32 %s1871_s11, 4  ;;  %s1727_s12 = int_to_ptr.vmem [resolvable:$false] %s1726_s12 }
  0x41   : > { %s1728_s14 = scalar_lea.vmem %s1727_s12, 4096  ;;  %p1729_p3 = scmp.lt.s32.totalorder %s2019_s6, %s1727_s12 }
  0x42   : > { %p1724_p10 = pnand %p1722_p8, %p1708_p0  ;;  %p1730_p7 = scmp.lt.s32.totalorder %s1728_s14, %s1721_s29 }
  0x44   : > { %p1725_p13 = pneg %p1724_p10  ;;  %p1731_p9 = por %p1730_p7, %p1729_p3 }
  0x46   : > { %p1732_p1 = pnand %p1731_p9, %p1725_p13 }
  0x48   : > { %1735 = shalt.err (!%p1732_p1)
}
  0x49   : > { %1608 = dma.hbm_to_vmem [thread:$0]  (!%p2015_p11), %s2013_s15, 2048, %s2019_s6, %s2021_s27, %s1869_s16, %s1869_s16, %s1870_s17  }
  0x4a   : > { %p2724_p0 = scmp.ne.s32.totalorder %s2719_s26, 0 }
  0x4b   : > { %s2055_s8 = sand.u32 (!%p2724_p0), 1, %s1858_s19   ;;  %p2725_p5 = scmp.ne.s32.totalorder (!%p2724_p0), %s2717_s24, 0 }
  0x4c   : > { %229 = sbr.rel (%p2724_p0) target bundleno = 1124 (0x464), region = 32  ;;  %s1305_s13 = sshll.u32 (!%p2724_p0), %s2055_s8, 7 }
  0x4d   : > { %s232_s28 = scalar_lea.sflag (!%p2724_p0), [#allocation3], %s2055_s8  ;;  %s2061_s7 = scalar_lea.vmem (!%p2724_p0), [#allocation2], %s1305_s13 }
  0x53   : > { %1837 = dma.done.wait (%p2725_p5), %s232_s28, 2048  }
  0x54   : > { %1839 = vsyncadd (%p2725_p5), %s232_s28, 4294965248  ;;  %p2726_p11 = scmp.eq.s32.totalorder %s1929_s22, 0 }
  0x56   : > { %1841 = dma.done.wait (%p2726_p11), [#allocation6], 4096   ;;  %p2727_p2 = pmov %p2726_p11 }
  0x57   : > { %v308_v0 = vld [vmem:[#allocation5 + $0x80] sm:$0xff]  ;;  %v309_v1 = vld [vmem:[#allocation5 + $0x88] sm:$0xff]  ;;  %v310_v5 = vld [vmem:[#allocation5 + $0x90] sm:$0xff]  ;;  %s2551_s16 = scalar_lea.vmem [#allocation7], %s1305_s13  ;;  %s267_s17 = scalar_lea.vmem [#allocation8], %s2055_s8 }
  0x58   : > { %1843 = vsyncadd (%p2727_p2), [#allocation6], 4294963200  ;;  %v292_v2 = vld [vmem:[#allocation5] sm:$0xff]  ;;  %v1525_v3 = vpack.c.bf16 %v309_v1, %v308_v0  ;;  %v293_v4 = vld [vmem:[#allocation5 + $0x8] sm:$0xff]  ;;  %v519_v0 = vlaneseq  ;;  %s1118_s15 = sand.u32 1, %s1929_s22   ;;  %s1375_s6 = sshll.u32 %s1929_s22, 4 }
  0x59   : > { %v311_v6 = vld [vmem:[#allocation5 + $0x98] sm:$0xff]  ;;  %v1527_v7 = vpack.c.bf16 %v293_v4, %v292_v2  ;;  %v294_v9 = vld [vmem:[#allocation5 + $0x10] sm:$0xff]  ;;  %v312_v11 = vld [vmem:[#allocation5 + $0xa0] sm:$0xff]  ;;  %s2591_s11 = scalar_lea.hbm %s2712_s4, %s1375_s6  ;;  %s1151_s12 = sshll.u32 %s267_s17, 4  ;;  %s2595_s12 = int_to_ptr.vmem [resolvable:$true] %s1151_s12 }
  0x5a   : > { %v1529_v8 = vpack.c.bf16 %v311_v6, %v310_v5  ;;  %1526 = vmatprep.subr.bf16.mxu0 %v1525_v3  ;;  %v295_v10 = vld [vmem:[#allocation5 + $0x18] sm:$0xff]  ;;  %1558 = vmatprep.subr.bf16.mxu1 %v1525_v3  ;;  %v313_v12 = vld [vmem:[#allocation5 + $0xa8] sm:$0xff]  ;;  %v296_v15 = vld [vmem:[#allocation5 + $0x20] sm:$0xff]  ;;  %v2152_v1 = vshrl.u32 %v519_v0, 7  ;;  %s2599_s14 = scalar_lea.sflag [#allocation9], %s1118_s15  ;;  %s1736_s13 = scalar_lea.vmem %s2595_s12, 16 }
  0x5b   : > { %1528 = vmatpush3.bf16.xpose.msra.mxu0 %v1527_v7  ;;  %1560 = vmatpush3.bf16.msra.mxu1 %v1527_v7  ;;  %v1531_v13 = vpack.c.bf16 %v295_v10, %v294_v9  ;;  %v1533_v14 = vpack.c.bf16 %v313_v12, %v312_v11  ;;  %v297_v16 = vld [vmem:[#allocation5 + $0x28] sm:$0xff]  ;;  %v314_v17 = vld [vmem:[#allocation5 + $0xb0] sm:$0xff]  ;;  %v315_v18 = vld [vmem:[#allocation5 + $0xb8] sm:$0xff]  ;;  %p1737_p4 = scmp.ne.s32.totalorder %s2595_s12, %s1736_s13  ;;  %s1873_s28 = smov [#allocation8]  }
  0x5c   : > { %1530 = vmatprep.subr.bf16.mxu0 %v1529_v8  ;;  %1562 = vmatprep.subr.bf16.mxu1 %v1529_v8  ;;  %v1535_v19 = vpack.c.bf16 %v297_v16, %v296_v15  ;;  %v2072_v20 = vld [vmem:[%s2061_s7] sm:$0xff]  ;;  %v1537_v21 = vpack.c.bf16 %v315_v18, %v314_v17  ;;  %v298_v22 = vld [vmem:[#allocation5 + $0x30] sm:$0xff]  ;;  %v299_v23 = vld [vmem:[#allocation5 + $0x38] sm:$0xff]  ;;  %v521_v2 = vsub.s32 0, %v2152_v1  ;;  %v525_v4 = vsub.s32 1, %v2152_v1 }
  0x5d   : > { %1413 = vmatprep.mubr.f32.mxu0 %v2072_v20  ;;  %v316_v24 = vld [vmem:[#allocation5 + $0xc0] sm:$0xff]  ;;  %v317_v25 = vld [vmem:[#allocation5 + $0xc8] sm:$0xff]  ;;  %v1539_v26 = vpack.c.bf16 %v299_v23, %v298_v22  ;;  %v318_v30 = vld [vmem:[#allocation5 + $0xd0] sm:$0xff]  ;;  %p1738_p6 = pnand %p1737_p4, %p2004_p12 }
  0x5e   : > { %v1541_v27 = vpack.c.bf16 %v317_v25, %v316_v24  ;;  %v300_v28 = vld [vmem:[#allocation5 + $0x40] sm:$0xff]  ;;  %v301_v29 = vld [vmem:[#allocation5 + $0x48] sm:$0xff]  ;;  %v319_v31 = vld [vmem:[#allocation5 + $0xd8] sm:$0xff] }
  0x5f   : > { %1564 = vmatpush3.bf16.msra.mxu1 %v1531_v13  ;;  %v1543_v32 = vpack.c.bf16 %v301_v29, %v300_v28  ;;  %v1545_v33 = vpack.c.bf16 %v319_v31, %v318_v30  ;;  %v302_v34 = vld [vmem:[#allocation5 + $0x50] sm:$0xff]  ;;  %v303_v35 = vld [vmem:[#allocation5 + $0x58] sm:$0xff]  ;;  %v320_v36 = vld [vmem:[#allocation5 + $0xe0] sm:$0xff]  ;;  %p1739_p8 = pneg %p1738_p6 }
  0x60   : > { %1566 = vmatprep.subr.bf16.mxu1 %v1533_v14  ;;  %v321_v37 = vld [vmem:[#allocation5 + $0xe8] sm:$0xff]  ;;  %v1547_v38 = vpack.c.bf16 %v303_v35, %v302_v34  ;;  %v304_v40 = vld [vmem:[#allocation5 + $0x60] sm:$0xff]  ;;  %v322_v42 = vld [vmem:[#allocation5 + $0xf0] sm:$0xff] }
  0x61   : > { %v1549_v39 = vpack.c.bf16 %v321_v37, %v320_v36  ;;  %v305_v41 = vld [vmem:[#allocation5 + $0x68] sm:$0xff]  ;;  %v323_v43 = vld [vmem:[#allocation5 + $0xf8] sm:$0xff]  ;;  %v306_v46 = vld [vmem:[#allocation5 + $0x70] sm:$0xff] }
  0x62   : > { %v1551_v44 = vpack.c.bf16 %v305_v41, %v304_v40  ;;  %v1553_v45 = vpack.c.bf16 %v323_v43, %v322_v42  ;;  %v307_v47 = vld [vmem:[#allocation5 + $0x78] sm:$0xff]  ;;  %v2076_v49 = vld [vmem:[%s2061_s7 + $0x8] sm:$0xff]  ;;  %v2081_v50 = vld [vmem:[%s2061_s7 + $0x10] sm:$0xff] }
  0x63   : > { %1532 = vmatpush3.bf16.xpose.msra.mxu0 %v1531_v13  ;;  %1568 = vmatpush3.bf16.msra.mxu1 %v1535_v19  ;;  %v1555_v48 = vpack.c.bf16 %v307_v47, %v306_v46  ;;  %v2086_v51 = vld [vmem:[%s2061_s7 + $0x18] sm:$0xff]  ;;  %v2091_v52 = vld [vmem:[%s2061_s7 + $0x20] sm:$0xff]  ;;  %v2096_v53 = vld [vmem:[%s2061_s7 + $0x28] sm:$0xff] }
  0x64   : > { %1534 = vmatprep.subr.bf16.mxu0 %v1533_v14  ;;  %1570 = vmatprep.subr.bf16.mxu1 %v1537_v21  ;;  %v2101_v54 = vld [vmem:[%s2061_s7 + $0x30] sm:$0xff]  ;;  %v2106_v55 = vld [vmem:[%s2061_s7 + $0x38] sm:$0xff]  ;;  %v2111_v56 = vld [vmem:[%s2061_s7 + $0x40] sm:$0xff] }
  0x65   : > { %v2116_v57 = vld [vmem:[%s2061_s7 + $0x48] sm:$0xff]  ;;  %v2121_v58 = vld [vmem:[%s2061_s7 + $0x50] sm:$0xff]  ;;  %v2126_v59 = vld [vmem:[%s2061_s7 + $0x58] sm:$0xff] }
  0x66   : > { %v2131_v60 = vld [vmem:[%s2061_s7 + $0x60] sm:$0xff]  ;;  %v2136_v61 = vld [vmem:[%s2061_s7 + $0x68] sm:$0xff]  ;;  %v2141_v62 = vld [vmem:[%s2061_s7 + $0x70] sm:$0xff] }
  0x67   : > { %1572 = vmatpush3.bf16.msra.mxu1 %v1539_v26  ;;  %v2146_v63 = vld [vmem:[%s2061_s7 + $0x78] sm:$0xff]  ;;  %v324_v3 = vld [vmem:[%s2710_s2] sm:$0x3]  ;;  %s1740_s7 = sshll.u32 %s1873_s28, 4  ;;  %s1741_s7 = int_to_ptr.vmem [resolvable:$false] %s1740_s7 }
  0x68   : > { %1574 = vmatprep.subr.bf16.mxu1 %v1541_v27  ;;  %v2159_v5 = vrot.slane %v324_v3, %v521_v2  ;;  %v2161_v7 = vrot.slane %v324_v3, %v525_v4  ;;  %s1742_s24 = scalar_lea.vmem %s1741_s7, 32  ;;  %p1743_p10 = scmp.lt.s32.totalorder %s2595_s12, %s1741_s7 }
  0x69   : > { %p1744_p13 = scmp.lt.s32.totalorder %s1742_s24, %s1736_s13 }
  0x6b   : > { %1536 = vmatpush3.bf16.xpose.msra.mxu0 %v1535_v19  ;;  %1576 = vmatpush3.bf16.msra.mxu1 %v1543_v32  ;;  %p1745_p3 = por %p1744_p13, %p1743_p10 }
  0x6c   : > { %1538 = vmatprep.subr.bf16.mxu0 %v1537_v21  ;;  %1578 = vmatprep.subr.bf16.mxu1 %v1545_v33 }
  0x6d   : > { %p1746_p7 = pnand %p1745_p3, %p1739_p8 }
  0x6f   : > { %1580 = vmatpush3.bf16.msra.mxu1 %v1547_v38 }
  0x70   : > { %1582 = vmatprep.subr.bf16.mxu1 %v1549_v39 }
  0x73   : > { %1540 = vmatpush3.bf16.xpose.msra.mxu0 %v1539_v26  ;;  %1584 = vmatpush3.bf16.msra.mxu1 %v1551_v44 }
  0x74   : > { %1542 = vmatprep.subr.bf16.mxu0 %v1541_v27  ;;  %1586 = vmatprep.subr.bf16.mxu1 %v1553_v45 }
  0x77   : > { %1588 = vmatpush3.bf16.msra.mxu1 %v1555_v48 }
  0x7b   : > { %1544 = vmatpush3.bf16.xpose.msra.mxu0 %v1543_v32 }
  0x7c   : > { %1546 = vmatprep.subr.bf16.mxu0 %v1545_v33 }
  0x83   : > { %1548 = vmatpush3.bf16.xpose.msra.mxu0 %v1547_v38 }
  0x84   : > { %1550 = vmatprep.subr.bf16.mxu0 %v1549_v39 }
  0x8b   : > { %1552 = vmatpush3.bf16.xpose.msra.mxu0 %v1551_v44 }
  0x8c   : > { %1554 = vmatprep.subr.bf16.mxu0 %v1553_v45 }
  0x93   : > { %1556 = vmatpush3.bf16.xpose.msra.mxu0 %v1555_v48 }
  0x9a   : > { %1414 = vmatmul.mubr.f32.vlgmr.msra.gmra.mrb[0].mxu0 %v2072_v20 }
  0x9b   : > { %1415 = vmatprep.mubr.f32.mxu0 %v2076_v49 }
  0x9e   : > { %1416 = vmatmul.mubr.f32.gmra.mrb[2].mxu0 %v2076_v49 }
  0x9f   : > { %1417 = vmatprep.mubr.f32.mxu0 %v2081_v50 }
  0xa2   : > { %1418 = vmatmul.mubr.f32.gmra.mrb[4].mxu0 %v2081_v50 }
  0xa3   : > { %1419 = vmatprep.mubr.f32.mxu0 %v2086_v51 }
  0xa6   : > { %1420 = vmatmul.mubr.f32.gmra.mrb[6].mxu0 %v2086_v51 }
  0xa7   : > { %1421 = vmatprep.mubr.f32.mxu0 %v2091_v52 }
  0xaa   : > { %1422 = vmatmul.mubr.f32.gmra.mrb[8].mxu0 %v2091_v52 }
  0xab   : > { %1423 = vmatprep.mubr.f32.mxu0 %v2096_v53 }
  0xae   : > { %1424 = vmatmul.mubr.f32.gmra.mrb[10].mxu0 %v2096_v53 }
  0xaf   : > { %1425 = vmatprep.mubr.f32.mxu0 %v2101_v54 }
  0xb2   : > { %1426 = vmatmul.mubr.f32.gmra.mrb[12].mxu0 %v2101_v54 }
  0xb3   : > { %1427 = vmatprep.mubr.f32.mxu0 %v2106_v55 }
  0xb6   : > { %1428 = vmatmul.mubr.f32.gmra.mrb[14].mxu0 %v2106_v55 }
  0xb7   : > { %1429 = vmatprep.mubr.f32.mxu0 %v2111_v56 }
  0xba   : > { %1430 = vmatmul.mubr.f32.gmra.mrb[16].mxu0 %v2111_v56 }
  0xbb   : > { %1431 = vmatprep.mubr.f32.mxu0 %v2116_v57 }
  0xbe   : > { %1432 = vmatmul.mubr.f32.gmra.mrb[18].mxu0 %v2116_v57 }
  0xbf   : > { %1433 = vmatprep.mubr.f32.mxu0 %v2121_v58 }
  0xc2   : > { %1434 = vmatmul.mubr.f32.gmra.mrb[20].mxu0 %v2121_v58 }
  0xc3   : > { %1435 = vmatprep.mubr.f32.mxu0 %v2126_v59 }
  0xc6   : > { %1436 = vmatmul.mubr.f32.gmra.mrb[22].mxu0 %v2126_v59 }
  0xc7   : > { %1437 = vmatprep.mubr.f32.mxu0 %v2131_v60 }
  0xca   : > { %1438 = vmatmul.mubr.f32.gmra.mrb[24].mxu0 %v2131_v60 }
  0xcb   : > { %1439 = vmatprep.mubr.f32.mxu0 %v2136_v61 }
  0xce   : > { %1440 = vmatmul.mubr.f32.gmra.mrb[26].mxu0 %v2136_v61 }
  0xcf   : > { %1441 = vmatprep.mubr.f32.mxu0 %v2141_v62 }
  0xd2   : > { %1442 = vmatmul.mubr.f32.gmra.mrb[28].mxu0 %v2141_v62 }
  0xd3   : > { %1443 = vmatprep.mubr.f32.mxu0 %v2146_v63 }
  0xd6   : > { %1444 = vmatmul.mubr.f32.gmra.mrb[30].mxu0 %v2146_v63 }
 0x16d   : > { %v391_v6 = vpop.f32.mrb[0].mxu0 }
 0x16e   : > { %v486_v8 = vmul.f32 2.0, %v391_v6  ;;  %v393_v9 = vpop.f32.mrb[1].mxu0 }
 0x16f   : > { %v487_v10 = vmul.f32 2.0, %v393_v9 }
 0x170   : > { %v2164_v11 = vsub.f32 %v2159_v5, %v486_v8 }
 0x171   : > { %v2167_v12 = vsub.f32 %v2161_v7, %v487_v10  ;;  %v397_v13 = vpop.f32.mrb[2].mxu0 }
 0x172   : > { %v488_v14 = vmul.f32 2.0, %v397_v13  ;;  %v399_v15 = vpop.f32.mrb[3].mxu0 }
 0x173   : > { %v489_v16 = vmul.f32 2.0, %v399_v15  ;;  %vm564_vm0 = vcmp.le.f32.partialorder %v2164_v11, %v2167_v12 }
 0x174   : > { %v2172_v17 = vsub.f32 %v2159_v5, %v488_v14  ;;  %v565_v18 = vsel %vm564_vm0, %v2164_v11, %v2167_v12 }
 0x175   : > { %v2180_v19 = vsub.f32 %v2161_v7, %v489_v16  ;;  %567 = vmin.index.xlane.f32.xlu0 %v565_v18  ;;  %v403_v21 = vpop.f32.mrb[4].mxu0 }
 0x176   : > { %v490_v22 = vmul.f32 2.0, %v403_v21  ;;  %v405_v23 = vpop.f32.mrb[5].mxu0 }
 0x177   : > { %v491_v24 = vmul.f32 2.0, %v405_v23  ;;  %vm572_vm1 = vcmp.le.f32.partialorder %v2172_v17, %v2180_v19 }
 0x178   : > { %v2185_v25 = vsub.f32 %v2159_v5, %v490_v22  ;;  %v573_v26 = vsel %vm572_vm1, %v2172_v17, %v2180_v19 }
 0x179   : > { %v2193_v27 = vsub.f32 %v2161_v7, %v491_v24  ;;  %575 = vmin.index.xlane.f32.xlu1 %v573_v26  ;;  %v409_v28 = vpop.f32.mrb[6].mxu0 }
 0x17a   : > { %v492_v29 = vmul.f32 2.0, %v409_v28  ;;  %v411_v30 = vpop.f32.mrb[7].mxu0 }
 0x17b   : > { %v493_v31 = vmul.f32 2.0, %v411_v30  ;;  %vm580_vm2 = vcmp.le.f32.partialorder %v2185_v25, %v2193_v27 }
 0x17c   : > { %v2198_v32 = vsub.f32 %v2159_v5, %v492_v29  ;;  %v581_v33 = vsel %vm580_vm2, %v2185_v25, %v2193_v27 }
 0x17d   : > { %v2206_v34 = vsub.f32 %v2161_v7, %v493_v31  ;;  %583 = vmin.index.xlane.f32.xlu1 %v581_v33  ;;  %v415_v35 = vpop.f32.mrb[8].mxu0 }
 0x17e   : > { %v494_v36 = vmul.f32 2.0, %v415_v35  ;;  %v417_v37 = vpop.f32.mrb[9].mxu0 }
 0x17f   : > { %v495_v38 = vmul.f32 2.0, %v417_v37  ;;  %vm588_vm3 = vcmp.le.f32.partialorder %v2198_v32, %v2206_v34 }
 0x180   : > { %v2211_v39 = vsub.f32 %v2159_v5, %v494_v36  ;;  %v589_v40 = vsel %vm588_vm3, %v2198_v32, %v2206_v34 }
 0x181   : > { %v2219_v41 = vsub.f32 %v2161_v7, %v495_v38  ;;  %591 = vmin.index.xlane.f32.xlu0 %v589_v40  ;;  %v421_v42 = vpop.f32.mrb[10].mxu0 }
 0x182   : > { %v496_v43 = vmul.f32 2.0, %v421_v42  ;;  %v423_v44 = vpop.f32.mrb[11].mxu0 }
 0x183   : > { %v497_v45 = vmul.f32 2.0, %v423_v44  ;;  %vm596_vm4 = vcmp.le.f32.partialorder %v2211_v39, %v2219_v41 }
 0x184   : > { %v2224_v46 = vsub.f32 %v2159_v5, %v496_v43  ;;  %v597_v47 = vsel %vm596_vm4, %v2211_v39, %v2219_v41 }
 0x185   : > { %v2232_v48 = vsub.f32 %v2161_v7, %v497_v45  ;;  %599 = vmin.index.xlane.f32.xlu1 %v597_v47  ;;  %v427_v2 = vpop.f32.mrb[12].mxu0 }
 0x186   : > { %v498_v3 = vmul.f32 2.0, %v427_v2  ;;  %v429_v4 = vpop.f32.mrb[13].mxu0 }
 0x187   : > { %vm604_vm5 = vcmp.le.f32.partialorder %v2224_v46, %v2232_v48  ;;  %v499_v6 = vmul.f32 2.0, %v429_v4 }
 0x188   : > { %v605_v8 = vsel %vm604_vm5, %v2224_v46, %v2232_v48  ;;  %v2242_v9 = vsub.f32 %v2159_v5, %v498_v3 }
 0x189   : > { %607 = vmin.index.xlane.f32.xlu1 %v605_v8  ;;  %v2245_v10 = vsub.f32 %v2161_v7, %v499_v6  ;;  %v433_v13 = vpop.f32.mrb[14].mxu0 }
 0x18a   : > { %v500_v14 = vmul.f32 2.0, %v433_v13  ;;  %v435_v15 = vpop.f32.mrb[15].mxu0 }
 0x18b   : > { %v501_v16 = vmul.f32 2.0, %v435_v15  ;;  %vm612_vm6 = vcmp.le.f32.partialorder %v2242_v9, %v2245_v10 }
 0x18c   : > { %v2250_v18 = vsub.f32 %v2159_v5, %v500_v14  ;;  %v613_v21 = vsel %vm612_vm6, %v2242_v9, %v2245_v10 }
 0x18d   : > { %v2258_v22 = vsub.f32 %v2161_v7, %v501_v16  ;;  %615 = vmin.index.xlane.f32.xlu1 %v613_v21  ;;  %v439_v23 = vpop.f32.mrb[16].mxu0 }
 0x18e   : > { %v502_v24 = vmul.f32 2.0, %v439_v23  ;;  %v441_v26 = vpop.f32.mrb[17].mxu0 }
 0x18f   : > { %v503_v28 = vmul.f32 2.0, %v441_v26  ;;  %vm620_vm7 = vcmp.le.f32.partialorder %v2250_v18, %v2258_v22 }
 0x190   : > { %v2263_v29 = vsub.f32 %v2159_v5, %v502_v24  ;;  %v621_v30 = vsel %vm620_vm7, %v2250_v18, %v2258_v22 }
 0x191   : > { %v2271_v31 = vsub.f32 %v2161_v7, %v503_v28  ;;  %623 = vmin.index.xlane.f32.xlu1 %v621_v30  ;;  %v445_v33 = vpop.f32.mrb[18].mxu0 }
 0x192   : > { %v504_v35 = vmul.f32 2.0, %v445_v33  ;;  %v447_v36 = vpop.f32.mrb[19].mxu0 }
 0x193   : > { %vm628_vm8 = vcmp.le.f32.partialorder %v2263_v29, %v2271_v31  ;;  %v505_v37 = vmul.f32 2.0, %v447_v36 }
 0x194   : > { %v629_v38 = vsel %vm628_vm8, %v2263_v29, %v2271_v31  ;;  %v2281_v40 = vsub.f32 %v2159_v5, %v504_v35 }
 0x195   : > { %631 = vmin.index.xlane.f32.xlu1 %v629_v38  ;;  %v2284_v42 = vsub.f32 %v2161_v7, %v505_v37  ;;  %v451_v43 = vpop.f32.mrb[20].mxu0 }
 0x196   : > { %v506_v44 = vmul.f32 2.0, %v451_v43  ;;  %v453_v45 = vpop.f32.mrb[21].mxu0 }
 0x197   : > { %vm636_vm9 = vcmp.le.f32.partialorder %v2281_v40, %v2284_v42  ;;  %v507_v47 = vmul.f32 2.0, %v453_v45 }
 0x198   : > { %v637_v2 = vsel %vm636_vm9, %v2281_v40, %v2284_v42  ;;  %v2294_v3 = vsub.f32 %v2159_v5, %v506_v44 }
 0x199   : > { %639 = vmin.index.xlane.f32.xlu1 %v637_v2  ;;  %v2297_v4 = vsub.f32 %v2161_v7, %v507_v47  ;;  %v457_v6 = vpop.f32.mrb[22].mxu0 }
 0x19a   : > { %v508_v8 = vmul.f32 2.0, %v457_v6  ;;  %v459_v13 = vpop.f32.mrb[23].mxu0 }
 0x19b   : > { %vm644_vm10 = vcmp.le.f32.partialorder %v2294_v3, %v2297_v4  ;;  %v509_v14 = vmul.f32 2.0, %v459_v13 }
 0x19c   : > { %v645_v15 = vsel %vm644_vm10, %v2294_v3, %v2297_v4  ;;  %v2307_v16 = vsub.f32 %v2159_v5, %v508_v8 }
 0x19d   : > { %647 = vmin.index.xlane.f32.xlu1 %v645_v15  ;;  %v2310_v21 = vsub.f32 %v2161_v7, %v509_v14  ;;  %v463_v23 = vpop.f32.mrb[24].mxu0 }
 0x19e   : > { %v510_v24 = vmul.f32 2.0, %v463_v23  ;;  %v465_v26 = vpop.f32.mrb[25].mxu0 }
 0x19f   : > { %vm652_vm11 = vcmp.le.f32.partialorder %v2307_v16, %v2310_v21  ;;  %v511_v28 = vmul.f32 2.0, %v465_v26 }
 0x1a0   : > { %v653_v30 = vsel %vm652_vm11, %v2307_v16, %v2310_v21  ;;  %v2320_v33 = vsub.f32 %v2159_v5, %v510_v24  ;;  %v1872_v21 = vmov 1.0  }
 0x1a1   : > { %655 = vmin.index.xlane.f32.xlu1 %v653_v30  ;;  %v2323_v35 = vsub.f32 %v2161_v7, %v511_v28  ;;  %v469_v36 = vpop.f32.mrb[26].mxu0 }
 0x1a2   : > { %v512_v37 = vmul.f32 2.0, %v469_v36  ;;  %v471_v38 = vpop.f32.mrb[27].mxu0 }
 0x1a3   : > { %vm660_vm12 = vcmp.le.f32.partialorder %v2320_v33, %v2323_v35  ;;  %v513_v43 = vmul.f32 2.0, %v471_v38 }
 0x1a4   : > { %v661_v44 = vsel %vm660_vm12, %v2320_v33, %v2323_v35  ;;  %v2333_v45 = vsub.f32 %v2159_v5, %v512_v37 }
 0x1a5   : > { %663 = vmin.index.xlane.f32.xlu1 %v661_v44  ;;  %v2336_v47 = vsub.f32 %v2161_v7, %v513_v43  ;;  %v475_v2 = vpop.f32.mrb[28].mxu0 }
 0x1a6   : > { %v514_v6 = vmul.f32 2.0, %v475_v2  ;;  %v477_v8 = vpop.f32.mrb[29].mxu0 }
 0x1a7   : > { %v515_v13 = vmul.f32 2.0, %v477_v8  ;;  %vm668_vm15 = vcmp.le.f32.partialorder %v2333_v45, %v2336_v47 }
 0x1a8   : > { %v2339_v14 = vsub.f32 %v2159_v5, %v514_v6 }
 0x1a9   : > { %v2342_v15 = vsub.f32 %v2161_v7, %v515_v13  ;;  %v481_v23 = vpop.f32.mrb[30].mxu0 }
 0x1aa   : > { %v516_v24 = vmul.f32 2.0, %v481_v23  ;;  %v483_v26 = vpop.f32.mrb[31].mxu0 }
 0x1ab   : > { %v517_v28 = vmul.f32 2.0, %v483_v26  ;;  %vm676_vm13 = vcmp.le.f32.partialorder %v2339_v14, %v2342_v15 }
 0x1ac   : > { %v2347_v30 = vsub.f32 %v2159_v5, %v516_v24  ;;  %v677_v36 = vsel %vm676_vm13, %v2339_v14, %v2342_v15  ;;  %v669_v5 = vsel %vm668_vm15, %v2333_v45, %v2336_v47 }
 0x1ad   : > { %v2355_v37 = vsub.f32 %v2161_v7, %v517_v28  ;;  %v2372_v7 = vand.u32 127, %v519_v0 }
 0x1af   : > { %vm684_vm14 = vcmp.le.f32.partialorder %v2347_v30, %v2355_v37  ;;  %v2375_v44 = vadd.s32 128, %v2372_v7  ;;  %v953_v42 = vadd.s32 4294967288, %v2372_v7  ;;  %v960_v4 = vadd.s32 4294967280, %v2372_v7 }
 0x1b0   : > { %v685_v38 = vsel %vm684_vm14, %v2347_v30, %v2355_v37  ;;  %v951_v24 = vsub.s32 %v2372_v7, %v2152_v1  ;;  %v967_v26 = vadd.s32 4294967272, %v2372_v7  ;;  %v1016_v14 = vadd.s32 4294967216, %v2372_v7 }
 0x1b1   : > { %v566_v6 = vsel %vm564_vm0, %v2372_v7, %v2375_v44  ;;  %v574_v0 = vsel %vm572_vm1, %v2372_v7, %v2375_v44  ;;  %v582_v23 = vsel %vm580_vm2, %v2372_v7, %v2375_v44  ;;  %v590_v12 = vsel %vm588_vm3, %v2372_v7, %v2375_v44 }
 0x1b2   : > { %v598_v17 = vsel %vm596_vm4, %v2372_v7, %v2375_v44  ;;  %v606_v27 = vsel %vm604_vm5, %v2372_v7, %v2375_v44  ;;  %v614_v39 = vsel %vm612_vm6, %v2372_v7, %v2375_v44  ;;  %v630_v41 = vsel %vm628_vm8, %v2372_v7, %v2375_v44 }
 0x1b3   : > { %v622_v46 = vsel %vm620_vm7, %v2372_v7, %v2375_v44  ;;  %v638_v9 = vsel %vm636_vm9, %v2372_v7, %v2375_v44  ;;  %v646_v18 = vsel %vm644_vm10, %v2372_v7, %v2375_v44  ;;  %v654_v29 = vsel %vm652_vm11, %v2372_v7, %v2375_v44 }
 0x1b4   : > { %v662_v40 = vsel %vm660_vm12, %v2372_v7, %v2375_v44  ;;  %v956_v16 = vsub.s32 %v953_v42, %v2152_v1  ;;  %vm958_vm2 = vcmask 130112   ;;  %v963_v35 = vsub.s32 %v960_v4, %v2152_v1 }
 0x1b5   : > { %vm965_vm5 = vcmask 195712   ;;  %vm972_vm8 = vcmask 261312   ;;  %vm979_vm11 = vcmask 326912   ;;  %v670_v42 = vsel %vm668_vm15, %v2372_v7, %v2375_v44 }
 0x1b6   : > { %v678_v47 = vsel %vm676_vm13, %v2372_v7, %v2375_v44  ;;  %vm1021_vm13 = vcmask 720512  }
 0x202   : > { %v568_v43 = vpop.xlane.xlu0 %567 }
 0x203   : > { %1661 = vset.pattern.permute.xlu0 %v568_v43  ;;  %v970_v43 = vsub.s32 %v967_v26, %v2152_v1  ;;  %v1009_v26 = vadd.s32 4294967224, %v2372_v7 }
 0x206   : > { %v576_v2 = vpop.xlane.xlu1 %575 }
 0x207   : > { %1662 = vset.pattern.permute.xlu1 %v576_v2  ;;  %570 = vperm.xlu0 %1661, %v566_v6   ;;  %v974_v6 = vadd.s32 4294967264, %v2372_v7 }
 0x20a   : > { %v584_v8 = vpop.xlane.xlu1 %583 }
 0x20b   : > { %1663 = vset.pattern.permute.xlu0 %v584_v8  ;;  %578 = vperm.xlu1 %1662, %v574_v0  }
 0x20e   : > { %v592_v13 = vpop.xlane.xlu0 %591 }
 0x20f   : > { %586 = vperm.xlu0 %1663, %v582_v23   ;;  %1664 = vset.pattern.permute.xlu1 %v592_v13  ;;  %v977_v23 = vsub.s32 %v974_v6, %v2152_v1 }
 0x212   : > { %v600_v11 = vpop.xlane.xlu1 %599 }
 0x213   : > { %1665 = vset.pattern.permute.xlu0 %v600_v11  ;;  %594 = vperm.xlu1 %1664, %v590_v12  }
 0x216   : > { %v608_v19 = vpop.xlane.xlu1 %607 }
 0x217   : > { %602 = vperm.xlu0 %1665, %v598_v17  }
 0x21a   : > { %v616_v25 = vpop.xlane.xlu1 %615 }
 0x21b   : > { %1666 = vset.pattern.permute.xlu0 %v608_v19  ;;  %1667 = vset.pattern.permute.xlu1 %v616_v25  ;;  %v981_v19 = vadd.s32 4294967256, %v2372_v7 }
 0x21e   : > { %v624_v32 = vpop.xlane.xlu1 %623 }
 0x21f   : > { %610 = vperm.xlu0 %1666, %v606_v27   ;;  %v984_v27 = vsub.s32 %v981_v19, %v2152_v1  ;;  %v1030_v19 = vadd.s32 4294967200, %v2372_v7 }
 0x222   : > { %v632_v34 = vpop.xlane.xlu1 %631 }
 0x223   : > { %1669 = vset.pattern.permute.xlu0 %v632_v34 }
 0x226   : > { %v640_v48 = vpop.xlane.xlu1 %639 }
 0x22a   : > { %v648_v10 = vpop.xlane.xlu1 %647 }
 0x22e   : > { %v656_v22 = vpop.xlane.xlu1 %655 }
 0x232   : > { %v664_v31 = vpop.xlane.xlu1 %663 }
 0x237   : > { %679 = vmin.index.xlane.f32.xlu1 %v677_v36 }
 0x23b   : > { %687 = vmin.index.xlane.f32.xlu1 %v685_v38 }
 0x23e   : > { %671 = vmin.index.xlane.f32.xlu0 %v669_v5 }
 0x24c   : > { %618 = vperm.xlu1 %1667, %v614_v39  }
 0x250   : > { %1668 = vset.pattern.permute.xlu1 %v624_v32 }
 0x254   : > { %634 = vperm.xlu0 %1669, %v630_v41   ;;  %626 = vperm.xlu1 %1668, %v622_v46   ;;  %v988_v46 = vadd.s32 4294967248, %v2372_v7 }
 0x258   : > { %1670 = vset.pattern.permute.xlu1 %v640_v48 }
 0x25c   : > { %642 = vperm.xlu1 %1670, %v638_v9   ;;  %v991_v9 = vsub.s32 %v988_v46, %v2152_v1 }
 0x260   : > { %1671 = vset.pattern.permute.xlu1 %v648_v10 }
 0x264   : > { %650 = vperm.xlu1 %1671, %v646_v18  }
 0x268   : > { %1672 = vset.pattern.permute.xlu1 %v656_v22  ;;  %v1002_v22 = vadd.s32 4294967232, %v2372_v7 }
 0x26c   : > { %658 = vperm.xlu1 %1672, %v654_v29   ;;  %v995_v29 = vadd.s32 4294967240, %v2372_v7 }
 0x26e   : > { %v998_v4 = vsub.s32 %v995_v29, %v2152_v1 }
 0x270   : > { %1673 = vset.pattern.permute.xlu1 %v664_v31 }
 0x274   : > { %666 = vperm.xlu1 %1673, %v662_v40  }
 0x286   : > { %v571_v3 = vpop.permute.xlu0 %570 }
 0x287   : > { %vm693_vm0 = vcmp.eq.s32.totalorder %v2375_v44, %v571_v3  ;;  %vm692_vm1 = vcmp.eq.s32.totalorder %v2372_v7, %v571_v3  ;;  %v952_v28 = vrot.slane %v571_v3, %v951_v24  ;;  %v1005_v3 = vsub.s32 %v1002_v22, %v2152_v1 }
 0x288   : > { %1340 = vmatprep.mubr.msk.f32.mxu1 %vm693_vm0, %v1872_v21 }
 0x289   : > { %1341 = vmatmul.mubr.msk.f32.vlgmr.msra.gmra.mrb[0].mxu1 %vm692_vm1, %v1872_v21  ;;  %vm986_vm1 = vcmask 392512  }
 0x28a   : > { %v579_v33 = vpop.permute.xlu1 %578 }
 0x28b   : > { %v957_v36 = vrot.slane %v579_v33, %v956_v16  ;;  %vm695_vm3 = vcmp.eq.s32.totalorder %v2375_v44, %v579_v33  ;;  %vm694_vm4 = vcmp.eq.s32.totalorder %v2372_v7, %v579_v33 }
 0x28c   : > { %1342 = vmatprep.mubr.msk.f32.mxu1 %vm695_vm3, %v1872_v21 }
 0x28d   : > { %v959_v38 = vsel %vm958_vm2, %v957_v36, %v952_v28  ;;  %1343 = vmatmul.mubr.msk.f32.gmra.mrb[2].mxu1 %vm694_vm4, %v1872_v21  ;;  %vm993_vm4 = vcmask 458112   ;;  %v1012_v36 = vsub.s32 %v1009_v26, %v2152_v1 }
 0x28e   : > { %v587_v5 = vpop.permute.xlu0 %586 }
 0x28f   : > { %v964_v2 = vrot.slane %v587_v5, %v963_v35  ;;  %vm697_vm6 = vcmp.eq.s32.totalorder %v2375_v44, %v587_v5  ;;  %vm696_vm7 = vcmp.eq.s32.totalorder %v2372_v7, %v587_v5 }
 0x290   : > { %1344 = vmatprep.mubr.msk.f32.mxu1 %vm697_vm6, %v1872_v21 }
 0x291   : > { %v966_v8 = vsel %vm965_vm5, %v964_v2, %v959_v38  ;;  %1345 = vmatmul.mubr.msk.f32.gmra.mrb[4].mxu1 %vm696_vm7, %v1872_v21  ;;  %vm1000_vm7 = vcmask 523712   ;;  %v1019_v2 = vsub.s32 %v1016_v14, %v2152_v1 }
 0x292   : > { %v595_v0 = vpop.permute.xlu1 %594 }
 0x293   : > { %v971_v13 = vrot.slane %v595_v0, %v970_v43  ;;  %vm699_vm9 = vcmp.eq.s32.totalorder %v2375_v44, %v595_v0  ;;  %vm698_vm10 = vcmp.eq.s32.totalorder %v2372_v7, %v595_v0  ;;  %v686_v43 = vsel %vm684_vm14, %v2372_v7, %v2375_v44 }
 0x294   : > { %1346 = vmatprep.mubr.msk.f32.mxu1 %vm699_vm9, %v1872_v21  ;;  %v1023_v0 = vadd.s32 4294967208, %v2372_v7  ;;  %vm1028_vm14 = vcmask 786112  }
 0x295   : > { %v973_v11 = vsel %vm972_vm8, %v971_v13, %v966_v8  ;;  %1347 = vmatmul.mubr.msk.f32.gmra.mrb[6].mxu1 %vm698_vm10, %v1872_v21  ;;  %vm1007_vm8 = vcmask 589312  }
 0x296   : > { %v603_v12 = vpop.permute.xlu0 %602  ;;  %v1026_v30 = vsub.s32 %v1023_v0, %v2152_v1 }
 0x297   : > { %v978_v17 = vrot.slane %v603_v12, %v977_v23  ;;  %vm701_vm12 = vcmp.eq.s32.totalorder %v2375_v44, %v603_v12  ;;  %vm700_vm0 = vcmp.eq.s32.totalorder %v2372_v7, %v603_v12 }
 0x298   : > { %1348 = vmatprep.mubr.msk.f32.mxu1 %vm701_vm12, %v1872_v21  ;;  %vm1014_vm12 = vcmask 654912  }
 0x299   : > { %v980_v25 = vsel %vm979_vm11, %v978_v17, %v973_v11  ;;  %1349 = vmatmul.mubr.msk.f32.gmra.mrb[8].mxu1 %vm700_vm0, %v1872_v21 }
 0x29e   : > { %v611_v32 = vpop.permute.xlu0 %610 }
 0x29f   : > { %v985_v34 = vrot.slane %v611_v32, %v984_v27  ;;  %vm703_vm2 = vcmp.eq.s32.totalorder %v2375_v44, %v611_v32  ;;  %vm702_vm3 = vcmp.eq.s32.totalorder %v2372_v7, %v611_v32  ;;  %v1044_v27 = vadd.s32 4294967184, %v2372_v7 }
 0x2a0   : > { %1350 = vmatprep.mubr.msk.f32.mxu1 %vm703_vm2, %v1872_v21  ;;  %v1033_v32 = vsub.s32 %v1030_v19, %v2152_v1 }
 0x2a1   : > { %v987_v39 = vsel %vm986_vm1, %v985_v34, %v980_v25  ;;  %1351 = vmatmul.mubr.msk.f32.gmra.mrb[10].mxu1 %vm702_vm3, %v1872_v21  ;;  %v1037_v25 = vadd.s32 4294967192, %v2372_v7  ;;  %v1047_v46 = vsub.s32 %v1044_v27, %v2152_v1 }
 0x2c4   : > { %v680_v41 = vpop.xlane.xlu1 %679 }
 0x2c8   : > { %v688_v48 = vpop.xlane.xlu1 %687 }
 0x2c9   : > { %1677 = vset.pattern.permute.xlu0 %v688_v48 }
 0x2cb   : > { %v672_v10 = vpop.xlane.xlu0 %671 }
 0x2cc   : > { %1674 = vset.pattern.permute.xlu1 %v672_v10  ;;  %v619_v18 = vpop.permute.xlu1 %618 }
 0x2cd   : > { %v992_v31 = vrot.slane %v619_v18, %v991_v9  ;;  %vm705_vm5 = vcmp.eq.s32.totalorder %v2375_v44, %v619_v18  ;;  %vm704_vm6 = vcmp.eq.s32.totalorder %v2372_v7, %v619_v18 }
 0x2ce   : > { %1352 = vmatprep.mubr.msk.f32.mxu1 %vm705_vm5, %v1872_v21 }
 0x2cf   : > { %v994_v40 = vsel %vm993_vm4, %v992_v31, %v987_v39  ;;  %1353 = vmatmul.mubr.msk.f32.gmra.mrb[12].mxu1 %vm704_vm6, %v1872_v21  ;;  %v1040_v39 = vsub.s32 %v1037_v25, %v2152_v1 }
 0x2d0   : > { %674 = vperm.xlu1 %1674, %v670_v42  }
 0x2d3   : > { %v635_v24 = vpop.permute.xlu0 %634  ;;  %v627_v16 = vpop.permute.xlu1 %626 }
 0x2d4   : > { %v1006_v33 = vrot.slane %v635_v24, %v1005_v3  ;;  %v999_v35 = vrot.slane %v627_v16, %v998_v4  ;;  %1675 = vset.pattern.permute.xlu1 %v680_v41  ;;  %vm707_vm9 = vcmp.eq.s32.totalorder %v2375_v44, %v627_v16  ;;  %vm706_vm10 = vcmp.eq.s32.totalorder %v2372_v7, %v627_v16 }
 0x2d5   : > { %1354 = vmatprep.mubr.msk.f32.mxu1 %vm707_vm9, %v1872_v21  ;;  %vm709_vm15 = vcmp.eq.s32.totalorder %v2375_v44, %v635_v24  ;;  %vm708_vm11 = vcmp.eq.s32.totalorder %v2372_v7, %v635_v24  ;;  %v1051_v41 = vadd.s32 4294967176, %v2372_v7 }
 0x2d6   : > { %v1001_v45 = vsel %vm1000_vm7, %v999_v35, %v994_v40  ;;  %1355 = vmatmul.mubr.msk.f32.gmra.mrb[14].mxu1 %vm706_vm10, %v1872_v21 }
 0x2d7   : > { %v1008_v28 = vsel %vm1007_vm8, %v1006_v33, %v1001_v45  ;;  %1356 = vmatprep.mubr.msk.f32.mxu1 %vm709_vm15, %v1872_v21  ;;  %v1054_v18 = vsub.s32 %v1051_v41, %v2152_v1 }
 0x2d8   : > { %682 = vperm.xlu1 %1675, %v678_v47  }
 0x2da   : > { %1357 = vmatmul.mubr.msk.f32.gmra.mrb[16].mxu1 %vm708_vm11, %v1872_v21  ;;  %vm1035_vm11 = vcmask 851712  }
 0x2db   : > { %v643_v38 = vpop.permute.xlu1 %642 }
 0x2dc   : > { %v1013_v5 = vrot.slane %v643_v38, %v1012_v36  ;;  %1676 = vset.pattern.permute.xlu1 %v688_v48  ;;  %vm711_vm0 = vcmp.eq.s32.totalorder %v2375_v44, %v643_v38  ;;  %vm710_vm1 = vcmp.eq.s32.totalorder %v2372_v7, %v643_v38 }
 0x2dd   : > { %1358 = vmatprep.mubr.msk.f32.mxu1 %vm711_vm0, %v1872_v21  ;;  %vm1049_vm0 = vcmask 982912  }
 0x2de   : > { %v1015_v15 = vsel %vm1014_vm12, %v1013_v5, %v1008_v28  ;;  %1359 = vmatmul.mubr.msk.f32.gmra.mrb[18].mxu1 %vm710_vm1, %v1872_v21  ;;  %vm1042_vm12 = vcmask 917312   ;;  %vm1056_vm1 = vcmask 1048512  }
 0x2e0   : > { %690 = vperm.xlu1 %1676, %v686_v43  }
 0x2e3   : > { %v651_v6 = vpop.permute.xlu1 %650 }
 0x2e4   : > { %v1020_v8 = vrot.slane %v651_v6, %v1019_v2  ;;  %vm713_vm2 = vcmp.eq.s32.totalorder %v2375_v44, %v651_v6  ;;  %vm712_vm3 = vcmp.eq.s32.totalorder %v2372_v7, %v651_v6 }
 0x2e5   : > { %1360 = vmatprep.mubr.msk.f32.mxu1 %vm713_vm2, %v1872_v21 }
 0x2e6   : > { %v1022_v13 = vsel %vm1021_vm13, %v1020_v8, %v1015_v15  ;;  %1361 = vmatmul.mubr.msk.f32.gmra.mrb[20].mxu1 %vm712_vm3, %v1872_v21 }
 0x2eb   : > { %v659_v37 = vpop.permute.xlu1 %658 }
 0x2ec   : > { %v1027_v23 = vrot.slane %v659_v37, %v1026_v30  ;;  %vm715_vm4 = vcmp.eq.s32.totalorder %v2375_v44, %v659_v37  ;;  %vm714_vm5 = vcmp.eq.s32.totalorder %v2372_v7, %v659_v37 }
 0x2ed   : > { %1362 = vmatprep.mubr.msk.f32.mxu1 %vm715_vm4, %v1872_v21 }
 0x2ee   : > { %v1029_v11 = vsel %vm1028_vm14, %v1027_v23, %v1022_v13  ;;  %1363 = vmatmul.mubr.msk.f32.gmra.mrb[22].mxu1 %vm714_vm5, %v1872_v21 }
 0x2f3   : > { %v667_v12 = vpop.permute.xlu1 %666 }
 0x2f4   : > { %vm717_vm6 = vcmp.eq.s32.totalorder %v2375_v44, %v667_v12  ;;  %vm716_vm7 = vcmp.eq.s32.totalorder %v2372_v7, %v667_v12  ;;  %v1034_v48 = vrot.slane %v667_v12, %v1033_v32 }
 0x2f5   : > { %1364 = vmatprep.mubr.msk.f32.mxu1 %vm717_vm6, %v1872_v21 }
 0x2f6   : > { %1365 = vmatmul.mubr.msk.f32.gmra.mrb[24].mxu1 %vm716_vm7, %v1872_v21  ;;  %v1036_v40 = vsel %vm1035_vm11, %v1034_v48, %v1029_v11 }
 0x34f   : > { %v675_v17 = vpop.permute.xlu1 %674 }
 0x350   : > { %vm719_vm8 = vcmp.eq.s32.totalorder %v2375_v44, %v675_v17  ;;  %vm718_vm9 = vcmp.eq.s32.totalorder %v2372_v7, %v675_v17  ;;  %v1041_v9 = vrot.slane %v675_v17, %v1040_v39 }
 0x351   : > { %1366 = vmatprep.mubr.msk.f32.mxu1 %vm719_vm8, %v1872_v21 }
 0x352   : > { %1367 = vmatmul.mubr.msk.f32.gmra.mrb[26].mxu1 %vm718_vm9, %v1872_v21  ;;  %v1043_v3 = vsel %vm1042_vm12, %v1041_v9, %v1036_v40 }
 0x357   : > { %v683_v34 = vpop.permute.xlu1 %682 }
 0x358   : > { %vm721_vm10 = vcmp.eq.s32.totalorder %v2375_v44, %v683_v34  ;;  %vm720_vm15 = vcmp.eq.s32.totalorder %v2372_v7, %v683_v34  ;;  %v1048_v22 = vrot.slane %v683_v34, %v1047_v46 }
 0x359   : > { %1368 = vmatprep.mubr.msk.f32.mxu1 %vm721_vm10, %v1872_v21 }
 0x35a   : > { %1369 = vmatmul.mubr.msk.f32.gmra.mrb[28].mxu1 %vm720_vm15, %v1872_v21  ;;  %v1050_v24 = vsel %vm1049_vm0, %v1048_v22, %v1043_v3 }
 0x35c   : > { %v1477_v10 = vpop.f32.mrb[0].mxu1 }
 0x35d   : > { %v1478_v29 = vpop.f32.mrb[1].mxu1 }
 0x35e   : > { %v1479_v31 = vadd.f32 %v1478_v29, %v1477_v10 }
 0x35f   : > { %v691_v42 = vpop.permute.xlu1 %690 }
 0x360   : > { %933 = vst [vmem:[%s2551_s16] sm:$0xff] %v1479_v31  ;;  %vm722_vm13 = vcmp.eq.s32.totalorder %v2372_v7, %v691_v42  ;;  %vm723_vm2 = vcmp.eq.s32.totalorder %v2375_v44, %v691_v42  ;;  %v1055_v1 = vrot.slane %v691_v42, %v1054_v18  ;;  %v1480_v4 = vpop.f32.mrb[2].mxu1  ;;  %v1059_v33 = vsub.f32 %v1479_v31, %v2072_v20 }
 0x361   : > { %v1481_v16 = vpop.f32.mrb[3].mxu1  ;;  %1370 = vmatprep.mubr.msk.f32.mxu1 %vm723_vm2, %v1872_v21 }
 0x362   : > { %v1057_v35 = vsel %vm1056_vm1, %v1055_v1, %v1050_v24  ;;  %v1482_v26 = vadd.f32 %v1481_v16, %v1480_v4  ;;  %1371 = vmatmul.mubr.msk.f32.gmra.mrb[30].mxu1 %vm722_vm13, %v1872_v21  ;;  %v1075_v47 = vmul.f32 %v1059_v33, %v1059_v33 }
 0x363   : > { %1058 = vst [vmem:[%s267_s17] sm:$0x1] %v1057_v35 }
 0x364   : > { %934 = vst [vmem:[%s2551_s16 + $0x8] sm:$0xff] %v1482_v26  ;;  %v1060_v7 = vsub.f32 %v1482_v26, %v2076_v49  ;;  %v1483_v44 = vpop.f32.mrb[4].mxu1 }
 0x365   : > { %v1484_v45 = vpop.f32.mrb[5].mxu1 }
 0x366   : > { %v1076_v28 = vmul.f32 %v1060_v7, %v1060_v7  ;;  %v1485_v36 = vadd.f32 %v1484_v45, %v1483_v44 }
 0x368   : > { %v1091_v38 = vadd.f32 %v1076_v28, %v1075_v47  ;;  %935 = vst [vmem:[%s2551_s16 + $0x10] sm:$0xff] %v1485_v36  ;;  %v1061_v20 = vsub.f32 %v1485_v36, %v2081_v50  ;;  %v1486_v5 = vpop.f32.mrb[6].mxu1 }
 0x369   : > { %v1487_v14 = vpop.f32.mrb[7].mxu1 }
 0x36a   : > { %v1077_v21 = vmul.f32 %v1061_v20, %v1061_v20  ;;  %v1488_v15 = vadd.f32 %v1487_v14, %v1486_v5 }
 0x36c   : > { %v1092_v43 = vadd.f32 %v1091_v38, %v1077_v21  ;;  %936 = vst [vmem:[%s2551_s16 + $0x18] sm:$0xff] %v1488_v15  ;;  %v1062_v2 = vsub.f32 %v1488_v15, %v2086_v51  ;;  %v1489_v49 = vpop.f32.mrb[8].mxu1 }
 0x36d   : > { %v1490_v6 = vpop.f32.mrb[9].mxu1 }
 0x36e   : > { %v1078_v8 = vmul.f32 %v1062_v2, %v1062_v2  ;;  %v1491_v0 = vadd.f32 %v1490_v6, %v1489_v49 }
 0x370   : > { %v1093_v13 = vadd.f32 %v1092_v43, %v1078_v8  ;;  %937 = vst [vmem:[%s2551_s16 + $0x20] sm:$0xff] %v1491_v0  ;;  %v1063_v30 = vsub.f32 %v1491_v0, %v2091_v52 }
 0x372   : > { %v1079_v37 = vmul.f32 %v1063_v30, %v1063_v30 }
 0x374   : > { %v1094_v50 = vadd.f32 %v1093_v13, %v1079_v37  ;;  %v1492_v23 = vpop.f32.mrb[10].mxu1 }
 0x375   : > { %v1493_v11 = vpop.f32.mrb[11].mxu1 }
 0x376   : > { %v1494_v12 = vadd.f32 %v1493_v11, %v1492_v23 }
 0x378   : > { %938 = vst [vmem:[%s2551_s16 + $0x28] sm:$0xff] %v1494_v12  ;;  %v1064_v17 = vsub.f32 %v1494_v12, %v2096_v53 }
 0x37a   : > { %v1080_v19 = vmul.f32 %v1064_v17, %v1064_v17 }
 0x37c   : > { %v1095_v51 = vadd.f32 %v1094_v50, %v1080_v19 }
 0x3a2   : > { %v1495_v25 = vpop.f32.mrb[12].mxu1 }
 0x3a3   : > { %v1496_v27 = vpop.f32.mrb[13].mxu1 }
 0x3a4   : > { %v1497_v32 = vadd.f32 %v1496_v27, %v1495_v25 }
 0x3a6   : > { %939 = vst [vmem:[%s2551_s16 + $0x30] sm:$0xff] %v1497_v32  ;;  %v1065_v34 = vsub.f32 %v1497_v32, %v2101_v54 }
 0x3a8   : > { %v1081_v39 = vmul.f32 %v1065_v34, %v1065_v34 }
 0x3a9   : > { %v1498_v41 = vpop.f32.mrb[14].mxu1 }
 0x3aa   : > { %v1096_v52 = vadd.f32 %v1095_v51, %v1081_v39  ;;  %v1499_v46 = vpop.f32.mrb[15].mxu1 }
 0x3ab   : > { %v1500_v48 = vadd.f32 %v1499_v46, %v1498_v41 }
 0x3ad   : > { %940 = vst [vmem:[%s2551_s16 + $0x38] sm:$0xff] %v1500_v48  ;;  %v1066_v9 = vsub.f32 %v1500_v48, %v2106_v55  ;;  %v1501_v10 = vpop.f32.mrb[16].mxu1 }
 0x3ae   : > { %v1502_v53 = vpop.f32.mrb[17].mxu1 }
 0x3af   : > { %v1082_v18 = vmul.f32 %v1066_v9, %v1066_v9  ;;  %v1503_v22 = vadd.f32 %v1502_v53, %v1501_v10 }
 0x3b1   : > { %v1097_v29 = vadd.f32 %v1096_v52, %v1082_v18  ;;  %941 = vst [vmem:[%s2551_s16 + $0x40] sm:$0xff] %v1503_v22  ;;  %v1067_v31 = vsub.f32 %v1503_v22, %v2111_v56  ;;  %v1504_v40 = vpop.f32.mrb[18].mxu1 }
 0x3b2   : > { %v1505_v54 = vpop.f32.mrb[19].mxu1 }
 0x3b3   : > { %v1083_v42 = vmul.f32 %v1067_v31, %v1067_v31  ;;  %v1506_v3 = vadd.f32 %v1505_v54, %v1504_v40 }
 0x3b5   : > { %v1098_v1 = vadd.f32 %v1097_v29, %v1083_v42  ;;  %942 = vst [vmem:[%s2551_s16 + $0x48] sm:$0xff] %v1506_v3  ;;  %v1068_v4 = vsub.f32 %v1506_v3, %v2116_v57 }
 0x3b7   : > { %v1084_v24 = vmul.f32 %v1068_v4, %v1068_v4 }
 0x3b9   : > { %v1507_v55 = vpop.f32.mrb[20].mxu1  ;;  %v1099_v16 = vadd.f32 %v1098_v1, %v1084_v24 }
 0x3ba   : > { %v1508_v33 = vpop.f32.mrb[21].mxu1 }
 0x3bb   : > { %v1509_v35 = vadd.f32 %v1508_v33, %v1507_v55 }
 0x3bd   : > { %943 = vst [vmem:[%s2551_s16 + $0x50] sm:$0xff] %v1509_v35  ;;  %v1069_v56 = vsub.f32 %v1509_v35, %v2121_v58 }
 0x3bf   : > { %v1085_v26 = vmul.f32 %v1069_v56, %v1069_v56 }
 0x3c1   : > { %v1100_v7 = vadd.f32 %v1099_v16, %v1085_v26  ;;  %v1510_v44 = vpop.f32.mrb[22].mxu1 }
 0x3c2   : > { %v1511_v45 = vpop.f32.mrb[23].mxu1 }
 0x3c3   : > { %v1512_v47 = vadd.f32 %v1511_v45, %v1510_v44 }
 0x3c5   : > { %944 = vst [vmem:[%s2551_s16 + $0x58] sm:$0xff] %v1512_v47  ;;  %v1070_v57 = vsub.f32 %v1512_v47, %v2126_v59 }
 0x3c7   : > { %v1086_v28 = vmul.f32 %v1070_v57, %v1070_v57 }
 0x3c9   : > { %v1101_v36 = vadd.f32 %v1100_v7, %v1086_v28  ;;  %v1513_v38 = vpop.f32.mrb[24].mxu1 }
 0x3ca   : > { %v1514_v20 = vpop.f32.mrb[25].mxu1 }
 0x3cb   : > { %v1515_v58 = vadd.f32 %v1514_v20, %v1513_v38 }
 0x3cd   : > { %945 = vst [vmem:[%s2551_s16 + $0x60] sm:$0xff] %v1515_v58  ;;  %v1071_v59 = vsub.f32 %v1515_v58, %v2131_v60 }
 0x3ce   : > { %1749 = shalt.err (!%p1746_p7)
}
 0x3cf   : > { %s1750_s26 = scalar_lea.hbm %s2591_s11, 16  ;;  %s1754_s27 = scalar_lea.hbm %s2712_s4, 32 }
 0x3d0   : > { %p1751_p9 = scmp.ne.s32.totalorder %s2591_s11, %s1750_s26  ;;  %p1755_p5 = scmp.lt.u32.totalorder %s2591_s11, %s2712_s4 }
 0x3d1   : > { %p1756_p11 = scmp.lt.u32.totalorder %s1754_s27, %s1750_s26  ;;  %p1758_p4 = scmp.lt.u32.totalorder %s1750_s26, %s2591_s11 }
 0x3d2   : > { %p1752_p1 = pnand %p1751_p9, %p2004_p12 }
 0x3d3   : > { %p1757_p2 = por %p1756_p11, %p1755_p5 }
 0x3d4   : > { %p1753_p0 = pneg %p1752_p1 }
 0x3d5   : > { %p1759_p6 = por %p1758_p4, %p1757_p2 }
 0x3d7   : > { %p1760_p8 = pnand %p1759_p6, %p1753_p0 }
 0x3d9   : > { %1763 = shalt.err (!%p1760_p8)
}
 0x3da   : > { %1596 = dma.vmem_to_hbm [thread:$0]  (%p2004_p12), %s2595_s12, 16, %s2591_s11, %s2599_s14   ;;  %v1087_v60 = vmul.f32 %v1071_v59, %v1071_v59 }
 0x3db   : > { %s1380_s11 = sshll.u32 %s1929_s22, 11  ;;  %s1135_s12 = sshll.u32 %s2551_s16, 4  ;;  %s2634_s12 = int_to_ptr.vmem [resolvable:$true] %s1135_s12 }
 0x3dc   : > { %v1102_v5 = vadd.f32 %v1101_v36, %v1087_v60  ;;  %s2632_s24 = scalar_lea.hbm %s2711_s3, %s1380_s11  ;;  %s1114_s26 = scalar_lea.sflag [#allocation4], %s2055_s8 }
 0x3dd   : > { %s1764_s17 = scalar_lea.vmem %s2634_s12, 2048  ;;  %s1874_s15 = smov [#allocation7]  }
 0x3de   : > { %p1765_p10 = scmp.ne.s32.totalorder %s2634_s12, %s1764_s17  ;;  %s1768_s27 = sshll.u32 %s1874_s15, 4  ;;  %s1769_s27 = int_to_ptr.vmem [resolvable:$false] %s1768_s27 }
 0x3df   : > { %s1770_s29 = scalar_lea.vmem %s1769_s27, 4096  ;;  %p1771_p7 = scmp.lt.s32.totalorder %s2634_s12, %s1769_s27 }
 0x3e0   : > { %p1766_p13 = pnand %p1765_p10, %p2004_p12  ;;  %p1772_p9 = scmp.lt.s32.totalorder %s1770_s29, %s1764_s17 }
 0x3e2   : > { %p1767_p3 = pneg %p1766_p13  ;;  %p1773_p1 = por %p1772_p9, %p1771_p7 }
 0x3e4   : > { %p1774_p0 = pnand %p1773_p1, %p1767_p3 }
 0x425   : > { %v1516_v14 = vpop.f32.mrb[26].mxu1 }
 0x426   : > { %v1517_v21 = vpop.f32.mrb[27].mxu1 }
 0x427   : > { %v1518_v15 = vadd.f32 %v1517_v21, %v1516_v14 }
 0x429   : > { %946 = vst [vmem:[%s2551_s16 + $0x68] sm:$0xff] %v1518_v15  ;;  %v1072_v43 = vsub.f32 %v1518_v15, %v2136_v61 }
 0x42b   : > { %v1088_v2 = vmul.f32 %v1072_v43, %v1072_v43 }
 0x42d   : > { %v1103_v49 = vadd.f32 %v1102_v5, %v1088_v2  ;;  %v1519_v6 = vpop.f32.mrb[28].mxu1 }
 0x42e   : > { %v1520_v8 = vpop.f32.mrb[29].mxu1 }
 0x42f   : > { %v1521_v0 = vadd.f32 %v1520_v8, %v1519_v6 }
 0x431   : > { %947 = vst [vmem:[%s2551_s16 + $0x70] sm:$0xff] %v1521_v0  ;;  %v1073_v13 = vsub.f32 %v1521_v0, %v2141_v62 }
 0x433   : > { %v1089_v30 = vmul.f32 %v1073_v13, %v1073_v13 }
 0x435   : > { %v1104_v37 = vadd.f32 %v1103_v49, %v1089_v30  ;;  %v1522_v50 = vpop.f32.mrb[30].mxu1 }
 0x436   : > { %v1523_v23 = vpop.f32.mrb[31].mxu1 }
 0x437   : > { %v1524_v61 = vadd.f32 %v1523_v23, %v1522_v50 }
 0x439   : > { %948 = vst [vmem:[%s2551_s16 + $0x78] sm:$0xff] %v1524_v61  ;;  %v1074_v62 = vsub.f32 %v1524_v61, %v2146_v63 }
 0x43a   : > { %1777 = shalt.err (!%p1774_p0)
}
 0x43b   : > { %s1778_s16 = scalar_lea.hbm %s2632_s24, 2048  ;;  %s1782_s13 = scalar_lea.hbm %s2711_s3, 4096 }
 0x43c   : > { %p1779_p5 = scmp.ne.s32.totalorder %s2632_s24, %s1778_s16  ;;  %p1783_p4 = scmp.lt.u32.totalorder %s2632_s24, %s2711_s3 }
 0x43d   : > { %p1784_p6 = scmp.lt.u32.totalorder %s1782_s13, %s1778_s16  ;;  %p1786_p10 = scmp.lt.u32.totalorder %s1778_s16, %s2632_s24 }
 0x43e   : > { %p1780_p11 = pnand %p1779_p5, %p2004_p12 }
 0x43f   : > { %p1785_p8 = por %p1784_p6, %p1783_p4 }
 0x440   : > { %p1781_p2 = pneg %p1780_p11 }
 0x441   : > { %p1787_p13 = por %p1786_p10, %p1785_p8 }
 0x443   : > { %p1788_p3 = pnand %p1787_p13, %p1781_p2 }
 0x445   : > { %1791 = shalt.err (!%p1788_p3)
}
 0x446   : > { %s1875_s17 = smov 128   ;;  %s1876_s27 = smov 8   ;;  %v1090_v63 = vmul.f32 %v1074_v62, %v1074_v62 }
 0x447   : > { %1595 = dma.vmem_to_hbm [thread:$0]  (%p2004_p12), %s2634_s12, 2048, %s2632_s24, %s1114_s26, %s1875_s17, %s1875_s17, %s1876_s27  }
 0x448   : > { %v1105_v11 = vadd.f32 %v1104_v37, %v1090_v63  ;;  %s273_s29 = scalar_lea.vmem [#allocation10], %s2055_s8  ;;  %s2668_s13 = scalar_lea.hbm %s2713_s5, %s1375_s6 }
 0x449   : > { %s1164_s16 = sshll.u32 %s273_s29, 4  ;;  %s1877_s24 = smov [#allocation10]   ;;  %s1165_s16 = int_to_ptr.vmem [resolvable:$true] %s1164_s16 }
 0x44a   : > { %v1106_v12 = vrot.slane %v1105_v11, 4  ;;  %s1792_s12 = scalar_lea.vmem %s1165_s16, 16  ;;  %s1796_s26 = sshll.u32 %s1877_s24, 4  ;;  %s1797_s26 = int_to_ptr.vmem [resolvable:$false] %s1796_s26 }
 0x44b   : > { %p1793_p7 = scmp.ne.s32.totalorder %s1165_s16, %s1792_s12  ;;  %s1798_s8 = scalar_lea.vmem %s1797_s26, 32 }
 0x44c   : > { %v1107_v17 = vadd.f32 %v1106_v12, %v1105_v11  ;;  %p1799_p0 = scmp.lt.s32.totalorder %s1165_s16, %s1797_s26  ;;  %p1800_p5 = scmp.lt.s32.totalorder %s1798_s8, %s1792_s12 }
 0x44d   : > { %p1794_p9 = pnand %p1793_p7, %p2004_p12 }
 0x44e   : > { %v1108_v19 = vrot.slane %v1107_v17, 2  ;;  %p1801_p11 = por %p1800_p5, %p1799_p0 }
 0x44f   : > { %p1795_p1 = pneg %p1794_p9 }
 0x450   : > { %v1109_v51 = vadd.f32 %v1108_v19, %v1107_v17 }
 0x451   : > { %p1802_p2 = pnand %p1801_p11, %p1795_p1 }
 0x452   : > { %v1110_v25 = vrot.slane %v1109_v51, 1 }
 0x454   : > { %v1111_v27 = vadd.f32 %v1110_v25, %v1109_v51 }
 0x456   : > { %1112 = vst [vmem:[%s273_s29] sm:$0x1] %v1111_v27 }
 0x457   : > { %1805 = shalt.err (!%p1802_p2)
}
 0x458   : > { %s1806_s22 = scalar_lea.hbm %s2668_s13, 16  ;;  %s1810_s15 = scalar_lea.hbm %s2713_s5, 32 }
 0x459   : > { %p1807_p4 = scmp.ne.s32.totalorder %s2668_s13, %s1806_s22  ;;  %p1811_p10 = scmp.lt.u32.totalorder %s2668_s13, %s2713_s5 }
 0x45a   : > { %p1812_p13 = scmp.lt.u32.totalorder %s1810_s15, %s1806_s22  ;;  %p1814_p7 = scmp.lt.u32.totalorder %s1806_s22, %s2668_s13 }
 0x45b   : > { %p1808_p6 = pnand %p1807_p4, %p2004_p12 }
 0x45c   : > { %p1813_p3 = por %p1812_p13, %p1811_p10 }
 0x45d   : > { %p1809_p8 = pneg %p1808_p6 }
 0x45e   : > { %p1815_p9 = por %p1814_p7, %p1813_p3 }
 0x460   : > { %p1816_p1 = pnand %p1815_p9, %p1809_p8 }
 0x462   : > { %1819 = shalt.err (!%p1816_p1)
}
 0x463   : > { %1597 = dma.vmem_to_hbm [thread:$0]  (%p2004_p12), %s1165_s16, 16, %s2668_s13, %s2599_s14  }
 0x464 PF: > { %s1176_s29 = sand.u32 1, %s1854_s18   ;;  %p2728_p0 = scmp.ne.s32.totalorder %s2718_s25, 0 }
 0x465   : > { %p2729_p5 = scmp.ge.s32.totalorder %s1866_s21, 2  ;;  %s1177_s28 = scalar_lea.sflag [#allocation4], %s1176_s29 }
 0x467   : > { %p1610_p11 = pnand %p2729_p5, %p2728_p0 }
 0x469   : > { %1845 = dma.done.wait (!%p1610_p11), %s1177_s28, 2048  }
 0x46a   : > { %1847 = vsyncadd (!%p1610_p11), %s1177_s28, 4294965248  ;;  %s1185_s11 = sand.u32 1, %s1297_s23  }
 0x46b   : > { %s1186_s12 = scalar_lea.sflag [#allocation9], %s1185_s11 }
 0x46c   : > { %1849 = dma.done.wait (!%p1610_p11), %s1186_s12, 32  }
 0x46d   : > { %1851 = vsyncadd (!%p1610_p11), %s1186_s12, 4294967264  ;;  %p23_p12 = scmp.ge.s32.totalorder %s1966_s30, 4   ;;  %s2730_s18 = smov %s1858_s19 }
 0x46e   : > { %s2731_s19 = smov %s1862_s20  ;;  %s2732_s20 = smov %s2000_s9 }
 0x46f   : > { %s2733_s21 = smov %s1966_s30  ;;  %25 = sbr.rel (!%p23_p12) target bundleno = 8 (0x8), region = 113 }
 0x476   :  { %1198 = vsyncpa [#allocation3], 1 }
 0x477   :  { %1200 = vsyncpa [#allocation3 + $0x1], 1 }
 0x478   :  { %1201 = vsyncpa [#allocation6], 1 }
 0x479   :  { %1202 = vsyncpa [#allocation4], 1 }
 0x47a   :  { %1204 = vsyncpa [#allocation4 + $0x1], 1 }
 0x47b   :  { %1205 = vsyncpa [#allocation9], 1 }
 0x47c   :  { %1207 = vsyncpa [#allocation9 + $0x1], 1 }

</bundles_post_ra>
